<compile_context>
chip_gen: v5e
topology: v5e:2x2
jax: 0.10.0
libtpu: 0.0.40
codegen_flags: <defaults>
</compile_context>

<pallas_src>
import jax
import jax.numpy as jnp
from jax import lax
from jax.experimental import pallas as pl
from jax.experimental.pallas import tpu as pltpu


# ----------------------------------------------------------------------------
# Pallas kernel: separable bilinear affine warp   out = Ky @ img @ Kx^T
# with Ky/Kx generated in-kernel (tent formula) from flat scalars in SMEM.
# Grid is (N,): each step handles one full image, so each K matrix is built
# exactly once per image.
# ----------------------------------------------------------------------------
def _warp_kernel(params_ref, img_ref, out_ref):
    b = pl.program_id(0)          # batch (image) index

    sy = params_ref[4 * b + 0]
    ty = params_ref[4 * b + 1]
    sx = params_ref[4 * b + 2]
    tx = params_ref[4 * b + 3]

    h, w = img_ref.shape

    # ---- Ky (h, h): bilinear row weights, tent formula on the VPU ----------
    # src_y is a (h, 1) column; col_y is the input-row index.  Clipping src
    # to [0, h-1] gives edge-replicate borders and makes the tent formula
    # exactly equal to the lo/hi one-hot construction.
    oy = lax.broadcasted_iota(jnp.int32, (h, 1), 0).astype(jnp.float32)
    src_y = jnp.clip(sy * oy + ty, 0.0, float(h - 1))
    col_y = lax.broadcasted_iota(jnp.int32, (h, h), 1).astype(jnp.float32)
    ky = jnp.maximum(0.0, 1.0 - jnp.abs(src_y - col_y))

    # ---- Kx (w, w): bilinear column weights ---------------------------------
    ox = lax.broadcasted_iota(jnp.int32, (w, 1), 0).astype(jnp.float32)
    src_x = jnp.clip(sx * ox + tx, 0.0, float(w - 1))
    col_x = lax.broadcasted_iota(jnp.int32, (w, w), 1).astype(jnp.float32)
    kx = jnp.maximum(0.0, 1.0 - jnp.abs(src_x - col_x))

    # ---- two MXU matmuls, f32 accumulation:  out = Ky @ img @ Kx^T ---------
    dt = img_ref.dtype            # bf16 operands, f32 accumulate
    tmp = jnp.dot(ky.astype(dt), img_ref[...],
                  preferred_element_type=jnp.float32)            # (h, w)
    out = lax.dot_general(tmp.astype(dt), kx.astype(dt),
                          dimension_numbers=(((1,), (1,)), ((), ())),
                          preferred_element_type=jnp.float32)    # (h, w)
    out_ref[...] = out.astype(out_ref.dtype)


def warp_images(imgs, params):
    """imgs: (N, H, W) float; params: (N, 4) f32 = [sy, ty, sx, tx] per image.

    Inverse map per image:  src = (sy*y + ty, sx*x + tx),  bilinear sampling,
    edge-replicated borders.  Returns (N, H, W) float32.
    """
    n, h, w = imgs.shape

    imgs_bf16 = imgs.astype(jnp.bfloat16)             # halve DMA bytes; f32 accum in-kernel
    params_flat = params.astype(jnp.float32).reshape(-1)   # flat 1-D SMEM, no 2-D padding

    return pl.pallas_call(
        _warp_kernel,
        out_shape=jax.ShapeDtypeStruct((n, h, w), jnp.float32),
        grid_spec=pltpu.PrefetchScalarGridSpec(
            num_scalar_prefetch=0,
            grid=(n,),
            in_specs=[
                # per-image transform scalars, whole flat array resident in SMEM
                pl.BlockSpec(memory_space=pltpu.MemorySpace.SMEM),
                # full image of the current batch element (leading dim squeezed)
                pl.BlockSpec((None, h, w), lambda b: (b, 0, 0)),
            ],
            # lane-dense (full-W) output slab
            out_specs=pl.BlockSpec((None, h, w), lambda b: (b, 0, 0)),
        ),
        compiler_params=pltpu.CompilerParams(
            dimension_semantics=("parallel",)),
    )(params_flat, imgs_bf16)


# ----------------------------------------------------------------------------
# GeometryAugmentation glue (deterministic "random" scale + translate)
# ----------------------------------------------------------------------------
def make_transform_params(key):
    """Inverse-warp params [sy, ty, sx, tx]: src = (sy*y + ty, sx*x + tx)."""
    k1, k2, k3, k4 = jax.random.split(key, 4)
    sy = jax.random.uniform(k1, (), minval=0.9, maxval=1.1)
    sx = jax.random.uniform(k2, (), minval=0.9, maxval=1.1)
    ty = jax.random.uniform(k3, (), minval=-4.0, maxval=4.0)
    tx = jax.random.uniform(k4, (), minval=-4.0, maxval=4.0)
    return jnp.stack([sy, ty, sx, tx]).astype(jnp.float32)


def transform_points(points_xy, params):
    """Forward map of landmark points (x, y): inverse of the image warp map."""
    sy, ty, sx, tx = params[0], params[1], params[2], params[3]
    x = (points_xy[:, 0] - tx) / sx
    y = (points_xy[:, 1] - ty) / sy
    return jnp.stack([x, y], axis=-1)


# ----------------------------------------------------------------------------
# DataAugmentation.forward equivalent (batched: B independent samples, each
# with its own random transform — same as calling the module B times, but all
# image warps are fused into ONE pallas_call).
# ----------------------------------------------------------------------------
def data_augmentation_forward(sample, key):
    imgs = sample['image']        # (B, C, H, W) float32, C==1 grayscale
    points = sample['points']     # (B, 2, 2)    float32  [(x1,y1), (x2,y2)]
    B, C, H_, W_ = imgs.shape

    keys = jax.random.split(key, B)
    params = jax.vmap(make_transform_params)(keys)            # (B, 4)

    # every channel of a sample shares that sample's transform
    params_bc = jnp.repeat(params, C, axis=0)                 # (B*C, 4)
    warped = warp_images(imgs.reshape(B * C, H_, W_).astype(jnp.float32),
                         params_bc)                           # (B*C, H, W) f32
    image_tensor = warped.reshape(B, C, H_, W_)               # ToTensor: CHW f32

    t_points = jax.vmap(transform_points)(points.astype(jnp.float32), params)
    # _reshape_points_tensor: (2,2) -> (1,4) -> (1,1,4), per sample
    points_tensor = jnp.reshape(t_points, (B, 1, 1, 4)).astype(jnp.float32)

    out = dict(sample)
    out['image'] = image_tensor
    out['points'] = points_tensor
    return out


# ----------------------------------------------------------------------------
# pure-JAX reference (same math, dense f32 interpolation matrices, one-hot
# construction — independent of the kernel's tent-formula implementation)
# ----------------------------------------------------------------------------
def _warp_reference(img, params):
    sy, ty, sx, tx = params[0], params[1], params[2], params[3]

    def interp(n, s, t):
        idx = jnp.arange(n, dtype=jnp.float32)
        src = jnp.clip(s * idx + t, 0.0, n - 1.0)
        lo = jnp.floor(src)
        w_ = src - lo
        lo_i = lo.astype(jnp.int32)
        hi_i = jnp.minimum(lo_i + 1, n - 1)
        return (jax.nn.one_hot(lo_i, n, dtype=jnp.float32) * (1.0 - w_)[:, None]
                + jax.nn.one_hot(hi_i, n, dtype=jnp.float32) * w_[:, None])

    ky = interp(img.shape[0], sy, ty)
    kx = interp(img.shape[1], sx, tx)
    return ky @ img @ kx.T


if __name__ == "__main__":
    # small stand-in for the module's (512, 512) img_shape; lane-dense W.
    # N = B*C = 2 keeps a >=2-wide parallel grid (both v7x TensorCores busy).
    B, C, H, W = 2, 1, 256, 256

    key = jax.random.PRNGKey(0)
    k_img, k_pts, k_aug = jax.random.split(key, 3)

    image = jax.random.uniform(k_img, (B, C, H, W), dtype=jnp.float32)
    points = jax.random.uniform(k_pts, (B, 2, 2), dtype=jnp.float32) * (H - 1)
    sample = {'image': image, 'points': points}

    fwd = jax.jit(data_augmentation_forward)
    out = fwd(sample, k_aug)
    jax.block_until_ready(out['image'])
    jax.block_until_ready(out['points'])

    assert out['image'].shape == (B, C, H, W) and out['image'].dtype == jnp.float32
    assert out['points'].shape == (B, 1, 1, 4) and out['points'].dtype == jnp.float32

    # numerical sanity check vs. pure-JAX f32 reference (bf16 operands -> loose tol)
    ref_params = jax.vmap(make_transform_params)(jax.random.split(k_aug, B))
    ref_img = jax.vmap(_warp_reference)(image[:, 0], ref_params)
    max_err = float(jnp.max(jnp.abs(out['image'][:, 0] - ref_img)))
    assert max_err < 0.05, f"max abs err {max_err}"

    ref_pts = jax.vmap(transform_points)(points, ref_params).reshape(B, 1, 1, 4)
    pts_err = float(jnp.max(jnp.abs(out['points'] - ref_pts)))
    assert pts_err < 1e-4, f"points max abs err {pts_err}"

    print("KERNEL_OK")
</pallas_src>

<mosaic_0001>
module attributes {stable_mosaic.version = 11 : i64} {
  func.func @_warp_kernel(%arg0: i32, %arg1: memref<8xf32, #tpu.memory_space<smem>>, %arg2: memref<1x256x256xbf16, #tpu.memory_space<vmem>>, %arg3: memref<1x256x256xf32, #tpu.memory_space<vmem>>) attributes {dimension_semantics = [#tpu.dimension_semantics<parallel>], iteration_bounds = array<i64: 2>, scalar_prefetch = 0 : i64, scratch_operands = 0 : i64, tpu.core_type = #tpu.core_type<tc>, window_params = [{transform_indices = @transform_0, window_bounds = array<i64: 8>}, {transform_indices = @transform_1, window_bounds = array<i64: 1, 256, 256>}, {transform_indices = @transform_2, window_bounds = array<i64: 1, 256, 256>}]} {
    %c4_i32 = arith.constant 4 : i32
    %0 = arith.muli %c4_i32, %arg0 : i32
    %c0_i32 = arith.constant 0 : i32
    %1 = arith.addi %0, %c0_i32 : i32
    %2 = arith.index_cast %1 : i32 to index
    %3 = memref.load %arg1[%2] : memref<8xf32, #tpu.memory_space<smem>>
    %c4_i32_0 = arith.constant 4 : i32
    %4 = arith.muli %c4_i32_0, %arg0 : i32
    %c1_i32 = arith.constant 1 : i32
    %5 = arith.addi %4, %c1_i32 : i32
    %6 = arith.index_cast %5 : i32 to index
    %7 = memref.load %arg1[%6] : memref<8xf32, #tpu.memory_space<smem>>
    %c4_i32_1 = arith.constant 4 : i32
    %8 = arith.muli %c4_i32_1, %arg0 : i32
    %c2_i32 = arith.constant 2 : i32
    %9 = arith.addi %8, %c2_i32 : i32
    %10 = arith.index_cast %9 : i32 to index
    %11 = memref.load %arg1[%10] : memref<8xf32, #tpu.memory_space<smem>>
    %c4_i32_2 = arith.constant 4 : i32
    %12 = arith.muli %c4_i32_2, %arg0 : i32
    %c3_i32 = arith.constant 3 : i32
    %13 = arith.addi %12, %c3_i32 : i32
    %14 = arith.index_cast %13 : i32 to index
    %15 = memref.load %arg1[%14] : memref<8xf32, #tpu.memory_space<smem>>
    %16 = tpu.iota {dimensions = array<i32: 0>} : vector<256x1xi32>
    %17 = arith.sitofp %16 : vector<256x1xi32> to vector<256x1xf32>
    %18 = vector.broadcast %3 : f32 to vector<256x1xf32>
    %19 = arith.mulf %18, %17 : vector<256x1xf32>
    %20 = vector.broadcast %7 : f32 to vector<256x1xf32>
    %21 = arith.addf %19, %20 : vector<256x1xf32>
    %cst = arith.constant 0.000000e+00 : f32
    %cst_3 = arith.constant 2.550000e+02 : f32
    %22 = vector.broadcast %cst : f32 to vector<256x1xf32>
    %23 = arith.maximumf %22, %21 : vector<256x1xf32>
    %24 = vector.broadcast %cst_3 : f32 to vector<256x1xf32>
    %25 = arith.minimumf %24, %23 : vector<256x1xf32>
    %26 = tpu.iota {dimensions = array<i32: 1>} : vector<256x256xi32>
    %27 = arith.sitofp %26 : vector<256x256xi32> to vector<256x256xf32>
    %28 = vector.broadcast %25 : vector<256x1xf32> to vector<256x256xf32>
    %29 = arith.subf %28, %27 : vector<256x256xf32>
    %30 = math.absf %29 : vector<256x256xf32>
    %cst_4 = arith.constant 1.000000e+00 : f32
    %31 = vector.broadcast %cst_4 : f32 to vector<256x256xf32>
    %32 = arith.subf %31, %30 : vector<256x256xf32>
    %cst_5 = arith.constant 0.000000e+00 : f32
    %33 = vector.broadcast %cst_5 : f32 to vector<256x256xf32>
    %34 = arith.maximumf %33, %32 : vector<256x256xf32>
    %35 = tpu.iota {dimensions = array<i32: 0>} : vector<256x1xi32>
    %36 = arith.sitofp %35 : vector<256x1xi32> to vector<256x1xf32>
    %37 = vector.broadcast %11 : f32 to vector<256x1xf32>
    %38 = arith.mulf %37, %36 : vector<256x1xf32>
    %39 = vector.broadcast %15 : f32 to vector<256x1xf32>
    %40 = arith.addf %38, %39 : vector<256x1xf32>
    %cst_6 = arith.constant 0.000000e+00 : f32
    %cst_7 = arith.constant 2.550000e+02 : f32
    %41 = vector.broadcast %cst_6 : f32 to vector<256x1xf32>
    %42 = arith.maximumf %41, %40 : vector<256x1xf32>
    %43 = vector.broadcast %cst_7 : f32 to vector<256x1xf32>
    %44 = arith.minimumf %43, %42 : vector<256x1xf32>
    %45 = tpu.iota {dimensions = array<i32: 1>} : vector<256x256xi32>
    %46 = arith.sitofp %45 : vector<256x256xi32> to vector<256x256xf32>
    %47 = vector.broadcast %44 : vector<256x1xf32> to vector<256x256xf32>
    %48 = arith.subf %47, %46 : vector<256x256xf32>
    %49 = math.absf %48 : vector<256x256xf32>
    %cst_8 = arith.constant 1.000000e+00 : f32
    %50 = vector.broadcast %cst_8 : f32 to vector<256x256xf32>
    %51 = arith.subf %50, %49 : vector<256x256xf32>
    %cst_9 = arith.constant 0.000000e+00 : f32
    %52 = vector.broadcast %cst_9 : f32 to vector<256x256xf32>
    %53 = arith.maximumf %52, %51 : vector<256x256xf32>
    %54 = arith.truncf %34 : vector<256x256xf32> to vector<256x256xbf16>
    %c0 = arith.constant 0 : index
    %c0_10 = arith.constant 0 : index
    %c0_11 = arith.constant 0 : index
    %55 = vector.load %arg2[%c0, %c0_10, %c0_11] : memref<1x256x256xbf16, #tpu.memory_space<vmem>>, vector<1x256x256xbf16>
    %56 = vector.shape_cast %55 : vector<1x256x256xbf16> to vector<256x256xbf16>
    %cst_12 = arith.constant dense<0.000000e+00> : vector<256x256xf32>
    %57 = tpu.matmul %54, %56, %cst_12 {dimension_numbers = #tpu.dot_dimension_numbers<[1], [0], [0], [1], [0, 0, 1, 1], [], []>} : vector<256x256xbf16>, vector<256x256xbf16>, vector<256x256xf32> -> vector<256x256xf32>
    %58 = arith.truncf %57 : vector<256x256xf32> to vector<256x256xbf16>
    %59 = arith.truncf %53 : vector<256x256xf32> to vector<256x256xbf16>
    %cst_13 = arith.constant dense<0.000000e+00> : vector<256x256xf32>
    %60 = tpu.matmul %58, %59, %cst_13 {dimension_numbers = #tpu.dot_dimension_numbers<[1], [1], [0], [0], [0, 0, 1, 0], [], []>} : vector<256x256xbf16>, vector<256x256xbf16>, vector<256x256xf32> -> vector<256x256xf32>
    %c0_14 = arith.constant 0 : index
    %c0_15 = arith.constant 0 : index
    %c0_16 = arith.constant 0 : index
    %61 = vector.load %arg3[%c0_14, %c0_15, %c0_16] : memref<1x256x256xf32, #tpu.memory_space<vmem>>, vector<1x256x256xf32>
    %62 = vector.shape_cast %61 : vector<1x256x256xf32> to vector<256x256xf32>
    %63 = vector.shape_cast %60 : vector<256x256xf32> to vector<1x256x256xf32>
    tpu.vector_store %arg3[%c0_14, %c0_15, %c0_16], %63 {strides = array<i32>} : memref<1x256x256xf32, #tpu.memory_space<vmem>>, vector<1x256x256xf32>,
    return
  }
  func.func @transform_0(%arg0: i32) -> i32 {
    %c0_i32 = arith.constant 0 : i32
    %c0_i32_0 = arith.constant 0 : i32
    return %c0_i32 : i32
  }
  func.func @transform_1(%arg0: i32) -> (i32, i32, i32) {
    %c0_i32 = arith.constant 0 : i32
    %c0_i32_0 = arith.constant 0 : i32
    %c0_i32_1 = arith.constant 0 : i32
    return %arg0, %c0_i32, %c0_i32_0 : i32, i32, i32
  }
  func.func @transform_2(%arg0: i32) -> (i32, i32, i32) {
    %c0_i32 = arith.constant 0 : i32
    %c0_i32_0 = arith.constant 0 : i32
    %c0_i32_1 = arith.constant 0 : i32
    return %arg0, %c0_i32, %c0_i32_0 : i32, i32, i32
  }
}

</mosaic_0001>

<bundles_post_ra>
// kernel: data_augmentation_forward.3
= control target key start
LH: loop header
LB: loop body
LE: loop exit
PB: predicated region body
PF: predicated region fallthrough
CT: control target
= control target key end

     0   :  { %7 = vsyncpa [#allocation4], 0  ;;  %s3474_s0 = inlined_call_operand.vmem [shape: f32[8], index: 0, kind: input, shape index: {}]   ;;  %s3475_s1 = inlined_call_operand.vmem [shape: bf16[2,256,256], index: 1, kind: input, shape index: {}]   ;;  %s3476_s2 = inlined_call_operand.hbm [shape: f32[2,256,256], index: 2, kind: output, shape index: {}]  }
   0x1   :  { %8 = vsyncpa [#allocation3], 0 }
   0x2   :  { %10 = vsyncpa [#allocation3 + $0x1], 0  ;;  %s2490_s9 = smov 0   ;;  %s2492_s10 = smov 0  }
   0x3   :  { %s2494_s11 = smov 0   ;;  %s2496_s12 = smov 0  }
   0x4 LB: > { %s2511_s13 = sadd.s32 4294967295, %s2470_s12   ;;  %s2160_s14 = sadd.s32 4294967294, %s2470_s12   ;;  %s2470_s12 = sphi %s2496_s12, %s3514_s12   ;;  %s2466_s11 = sphi %s2494_s11, %s3513_s11   ;;  %s2462_s10 = sphi %s2492_s10, %s3512_s10   ;;  %s2458_s9 = sphi %s2490_s9, %s3511_s9  }
   0x5   : > { %s2515_s15 = sadd.s32 1, %s2470_s12   ;;  %s70_s16 = sadd.s32 1, %s2466_s11 }
   0x6   : > { %s67_s17 = ssub.s32 %s2470_s12, %s2515_s15  ;;  %p80_p0 = scmp.ne.s32.totalorder %s2466_s11, %s2462_s10 }
   0x7   : > { %p68_p1 = scmp.eq.s32.totalorder %s67_s17, 0  ;;  %p81_p2 = scmp.eq.s32.totalorder %s2511_s13, 1 }
   0x8   : > { %p86_p3 = scmp.ne.s32.totalorder %s2462_s10, %s2458_s9  ;;  %p87_p4 = scmp.eq.s32.totalorder %s2160_s14, 1 }
   0x9   : > { %s2526_s18 = scalar_select %p68_p1, %s2466_s11, %s70_s16  }
   0xa   : > { %p2528_p5 = por %p81_p2, %p80_p0  ;;  %p2532_p6 = por %p87_p4, %p86_p3 }
   0xb   : > { %p2161_p7 = scmp.ge.s32.totalorder %s2470_s12, 1  ;;  %p94_p8 = scmp.lt.s32.totalorder %s2470_s12, 3 }
   0xc   : > { %p2351_p9 = scmp.eq.s32.totalorder %s2511_s13, 0  ;;  %s106_s23 = sshll.u32 %s3474_s0, 4  ;;  %s107_s23 = int_to_ptr.vmem [resolvable:$true] %s106_s23 }
   0xd   : > { %p95_p10 = pnand %p2161_p7, %p94_p8  ;;  %s2472_s24 = smov [#allocation2]  }
   0xf   : > { %p2343_p11 = pneg %p95_p10  ;;  %127 = sbr.rel (%p95_p10) target bundleno = 711 (0x2c7), region = 28 }
  0x11   : > { %p2344_p12 = pnand %p2351_p9, %p2343_p11 }
  0x13   : > { %2346 = dma.vmem_to_smem (!%p2344_p12), %s107_s23, 16, %s2472_s24, [#allocation4]  }
  0x14   : > { %2449 = dma.done.wait (%p2351_p9), [#allocation4], 16  }
  0x15   : > { %2451 = vsyncadd (%p2351_p9), [#allocation4], 4294967280 }
  0x16   : > { %134 = sfence }
  0x17   : > { %p151_p13 = scmp.lt.s32.totalorder %s2511_s13, 1  ;;  %s2544_s25 = sshll.u32 %s2511_s13, 2  ;;  %v164_v0 = vlaneseq }
  0x18   : > { %s2547_s26 = sld [smem:[#allocation2 + %s2544_s25]]  ;;  %s158_s27 = sadd.s32 1, %s2544_s25 }
  0x19   : > { %s152_s28 = scalar_select %p151_p13, %s2511_s13, 1  ;;  %v2551_v1 = vshrl.u32 %v164_v0, 7  ;;  %v2553_v2 = vand.u32 127, %v164_v0 }
  0x1a   : > { %s2555_s29 = sld [smem:[#allocation2 + %s158_s27]]  ;;  %s160_s30 = sadd.s32 2, %s2544_s25 }
  0x1b   : > { %s2303_s3 = sshll.u32 %s152_s28, 8  ;;  %s2558_s4 = sld [smem:[#allocation2 + %s160_s30]]  ;;  %v2566_v3 = vadd.s32 8, %v2551_v1  ;;  %v2569_v4 = vadd.s32 128, %v2553_v2  ;;  %v2573_v5 = vadd.s32 16, %v2551_v1  ;;  %v2576_v6 = vadd.s32 24, %v2551_v1 }
  0x1c   : > { %s2563_s7 = scalar_lea.vmem %s3475_s1, %s2303_s3  ;;  %s162_s8 = sadd.s32 3, %s2544_s25  ;;  %v3478_v49 = vcvt.s32.f32 %v2551_v1 }
  0x1d   : > { %v2228_v7 = vld [vmem:[%s2563_s7 + $0x70] sm:$0xf]  ;;  %v2319_v8 = vld [vmem:[%s2563_s7 + $0x74] sm:$0xf0]  ;;  %v2318_v12 = vld [vmem:[%s2563_s7 + $0x74] sm:$0xf]  ;;  %v3477_v50 = vcvt.s32.f32 %v2566_v3  ;;  %v3484_v51 = vcvt.s32.f32 %v2573_v5  ;;  %v3483_v56 = vcvt.s32.f32 %v2576_v6 }
  0x1e   : > { %v2292_v9 = vld [vmem:[%s2563_s7 + $0xf0] sm:$0xf]  ;;  %v2229_v10 = vor.u32 %v2319_v8, %v2228_v7  ;;  %v2335_v11 = vld [vmem:[%s2563_s7 + $0xf4] sm:$0xf0]  ;;  %v2230_v13 = vld [vmem:[%s2563_s7 + $0x78] sm:$0xf0]  ;;  %v2615_v55 = vstv %s2547_s26 }
  0x1f   : > { %v2293_v14 = vor.u32 %v2335_v11, %v2292_v9  ;;  %v2233_v15 = vor.u32 %v2318_v12, %v2230_v13  ;;  %v2334_v16 = vld [vmem:[%s2563_s7 + $0xf4] sm:$0xf]  ;;  %v2294_v17 = vld [vmem:[%s2563_s7 + $0xf8] sm:$0xf0]  ;;  %v2220_v18 = vld [vmem:[%s2563_s7 + $0x60] sm:$0xf]  ;;  %v230_v12 = vmul.f32 %v2615_v55, %v3478_v49  ;;  %v231_v13 = vmul.f32 %v2615_v55, %v3477_v50 }
  0x20   : > { %1230 = vmatpush.bf16.msra.mxu0 %v2229_v10  ;;  %v2297_v19 = vor.u32 %v2334_v16, %v2294_v17  ;;  %v2317_v20 = vld [vmem:[%s2563_s7 + $0x64] sm:$0xf0]  ;;  %v2284_v21 = vld [vmem:[%s2563_s7 + $0xe0] sm:$0xf]  ;;  %v2316_v25 = vld [vmem:[%s2563_s7 + $0x64] sm:$0xf] }
  0x21   : > { %v2333_v22 = vld [vmem:[%s2563_s7 + $0xe4] sm:$0xf0]  ;;  %1319 = vmatpush.bf16.msra.mxu1 %v2293_v14  ;;  %1408 = vmatpush.bf16.msra.mxu2 %v2233_v15  ;;  %v2221_v23 = vor.u32 %v2317_v20, %v2220_v18  ;;  %v2222_v26 = vld [vmem:[%s2563_s7 + $0x68] sm:$0xf0]  ;;  %v2332_v27 = vld [vmem:[%s2563_s7 + $0xe4] sm:$0xf]  ;;  %v232_v14 = vmul.f32 %v2615_v55, %v3484_v51  ;;  %v2650_v18 = vstv %s2555_s29 }
  0x22   : > { %v2285_v24 = vor.u32 %v2333_v22, %v2284_v21  ;;  %1497 = vmatpush.bf16.msra.mxu3 %v2297_v19  ;;  %v2225_v28 = vor.u32 %v2316_v25, %v2222_v26  ;;  %v2286_v29 = vld [vmem:[%s2563_s7 + $0xe8] sm:$0xf0]  ;;  %v2212_v30 = vld [vmem:[%s2563_s7 + $0x50] sm:$0xf]  ;;  %v2315_v31 = vld [vmem:[%s2563_s7 + $0x54] sm:$0xf0]  ;;  %v233_v19 = vmul.f32 %v2615_v55, %v3483_v56 }
  0x23   : > { %v2289_v32 = vor.u32 %v2332_v27, %v2286_v29  ;;  %v2276_v33 = vld [vmem:[%s2563_s7 + $0xd0] sm:$0xf]  ;;  %v2331_v34 = vld [vmem:[%s2563_s7 + $0xd4] sm:$0xf0]  ;;  %v2314_v35 = vld [vmem:[%s2563_s7 + $0x54] sm:$0xf]  ;;  %v2213_v36 = vor.u32 %v2315_v31, %v2212_v30  ;;  %v2672_v29 = vcvt.s32.f32 %v2553_v2  ;;  %v2675_v30 = vcvt.s32.f32 %v2569_v4 }
  0x24   : > { %1231 = vmatpush.bf16.msra.mxu0 %v2221_v23  ;;  %v2214_v37 = vld [vmem:[%s2563_s7 + $0x58] sm:$0xf0]  ;;  %v2330_v38 = vld [vmem:[%s2563_s7 + $0xd4] sm:$0xf]  ;;  %v2277_v40 = vor.u32 %v2331_v34, %v2276_v33  ;;  %v2204_v42 = vld [vmem:[%s2563_s7 + $0x40] sm:$0xf]  ;;  %v2689_v2 = vadd.f32 %v2650_v18, %v232_v14 }
  0x25   : > { %v2278_v39 = vld [vmem:[%s2563_s7 + $0xd8] sm:$0xf0]  ;;  %1320 = vmatpush.bf16.msra.mxu1 %v2285_v24  ;;  %1409 = vmatpush.bf16.msra.mxu2 %v2225_v28  ;;  %v2217_v41 = vor.u32 %v2314_v35, %v2214_v37  ;;  %v2313_v43 = vld [vmem:[%s2563_s7 + $0x44] sm:$0xf0]  ;;  %v2268_v44 = vld [vmem:[%s2563_s7 + $0xc0] sm:$0xf]  ;;  %v263_v35 = vadd.f32 %v2650_v18, %v230_v12 }
  0x26   : > { %1498 = vmatpush.bf16.msra.mxu3 %v2289_v32  ;;  %v2281_v45 = vor.u32 %v2330_v38, %v2278_v39  ;;  %v2329_v46 = vld [vmem:[%s2563_s7 + $0xc4] sm:$0xf0]  ;;  %v2312_v47 = vld [vmem:[%s2563_s7 + $0x44] sm:$0xf]  ;;  %v2206_v48 = vld [vmem:[%s2563_s7 + $0x48] sm:$0xf0]  ;;  %v2205_v57 = vor.u32 %v2313_v43, %v2204_v42  ;;  %v2704_v42 = vadd.f32 %v2650_v18, %v233_v19 }
  0x27   : > { %v2328_v52 = vld [vmem:[%s2563_s7 + $0xc4] sm:$0xf]  ;;  %v2270_v53 = vld [vmem:[%s2563_s7 + $0xc8] sm:$0xf0]  ;;  %v2196_v54 = vld [vmem:[%s2563_s7 + $0x30] sm:$0xf]  ;;  %v2269_v61 = vor.u32 %v2329_v46, %v2268_v44  ;;  %v2209_v62 = vor.u32 %v2312_v47, %v2206_v48 }
  0x28   : > { %1232 = vmatpush.bf16.msra.mxu0 %v2213_v36  ;;  %v2311_v58 = vld [vmem:[%s2563_s7 + $0x34] sm:$0xf0]  ;;  %v2260_v59 = vld [vmem:[%s2563_s7 + $0xb0] sm:$0xf]  ;;  %v2310_v63 = vld [vmem:[%s2563_s7 + $0x34] sm:$0xf]  ;;  %v2273_v8 = vor.u32 %v2328_v52, %v2270_v53  ;;  %v264_v36 = vadd.f32 %v2650_v18, %v231_v13 }
  0x29   : > { %v2327_v60 = vld [vmem:[%s2563_s7 + $0xb4] sm:$0xf0]  ;;  %1321 = vmatpush.bf16.msra.mxu1 %v2277_v40  ;;  %1410 = vmatpush.bf16.msra.mxu2 %v2217_v41  ;;  %v2198_v0 = vld [vmem:[%s2563_s7 + $0x38] sm:$0xf0]  ;;  %v2326_v7 = vld [vmem:[%s2563_s7 + $0xb4] sm:$0xf]  ;;  %v2197_v20 = vor.u32 %v2311_v58, %v2196_v54 }
  0x2a   : > { %1499 = vmatpush.bf16.msra.mxu3 %v2281_v45  ;;  %v2262_v9 = vld [vmem:[%s2563_s7 + $0xb8] sm:$0xf0]  ;;  %v2626_v10 = vld [vmem:[%s2563_s7 + $0x20] sm:$0xf]  ;;  %v2629_v11 = vld [vmem:[%s2563_s7 + $0x24] sm:$0xf0]  ;;  %v2261_v24 = vor.u32 %v2327_v60, %v2260_v59  ;;  %v2201_v25 = vor.u32 %v2310_v63, %v2198_v0 }
  0x2b   : > { %v2641_v15 = vld [vmem:[%s2563_s7 + $0xa0] sm:$0xf]  ;;  %v2644_v16 = vld [vmem:[%s2563_s7 + $0xa4] sm:$0xf0]  ;;  %v2647_v17 = vld [vmem:[%s2563_s7 + $0x24] sm:$0xf]  ;;  %v2265_v31 = vor.u32 %v2326_v7, %v2262_v9  ;;  %v2189_v4 = vor.u32 %v2629_v11, %v2626_v10 }
  0x2c   : > { %1233 = vmatpush.bf16.msra.mxu0 %v2205_v57  ;;  %v2190_v21 = vld [vmem:[%s2563_s7 + $0x28] sm:$0xf0]  ;;  %v2657_v22 = vld [vmem:[%s2563_s7 + $0xa4] sm:$0xf]  ;;  %v2663_v26 = vld [vmem:[%s2563_s7 + $0x10] sm:$0xf]  ;;  %v2253_v37 = vor.u32 %v2644_v16, %v2641_v15 }
  0x2d   : > { %v2660_v23 = vld [vmem:[%s2563_s7 + $0xa8] sm:$0xf0]  ;;  %1322 = vmatpush.bf16.msra.mxu1 %v2269_v61  ;;  %1411 = vmatpush.bf16.msra.mxu2 %v2209_v62  ;;  %v2666_v27 = vld [vmem:[%s2563_s7 + $0x14] sm:$0xf0]  ;;  %v2669_v28 = vld [vmem:[%s2563_s7 + $0x90] sm:$0xf]  ;;  %v2193_v38 = vor.u32 %v2647_v17, %v2190_v21  ;;  %v2734_v61 = vstv %s2558_s4 }
  0x2e   : > { %1500 = vmatpush.bf16.msra.mxu3 %v2273_v8  ;;  %v2678_v32 = vld [vmem:[%s2563_s7 + $0x94] sm:$0xf0]  ;;  %v2681_v33 = vld [vmem:[%s2563_s7 + $0x14] sm:$0xf]  ;;  %v2684_v34 = vld [vmem:[%s2563_s7 + $0x18] sm:$0xf0]  ;;  %v2257_v43 = vor.u32 %v2657_v22, %v2660_v23  ;;  %v2181_v44 = vor.u32 %v2666_v27, %v2663_v26 }
  0x2f   : > { %v2697_v39 = vld [vmem:[%s2563_s7 + $0x94] sm:$0xf]  ;;  %v2246_v40 = vld [vmem:[%s2563_s7 + $0x98] sm:$0xf0]  ;;  %v2701_v41 = vld [vmem:[%s2563_s7] sm:$0xf]  ;;  %v2245_v45 = vor.u32 %v2678_v32, %v2669_v28  ;;  %v2185_v46 = vor.u32 %v2681_v33, %v2684_v34 }
  0x30   : > { %1234 = vmatpush.bf16.msra.mxu0 %v2197_v20  ;;  %v2715_v47 = vld [vmem:[%s2563_s7 + $0x4] sm:$0xf0]  ;;  %v2718_v48 = vld [vmem:[%s2563_s7 + $0x80] sm:$0xf]  ;;  %v2249_v53 = vor.u32 %v2697_v39, %v2246_v40  ;;  %v2304_v58 = vld [vmem:[%s2563_s7 + $0x4] sm:$0xf] }
  0x31   : > { %v2721_v52 = vld [vmem:[%s2563_s7 + $0x84] sm:$0xf0]  ;;  %1323 = vmatpush.bf16.msra.mxu1 %v2261_v24  ;;  %1412 = vmatpush.bf16.msra.mxu2 %v2201_v25  ;;  %v2173_v54 = vor.u32 %v2715_v47, %v2701_v41  ;;  %v2174_v59 = vld [vmem:[%s2563_s7 + $0x8] sm:$0xf0]  ;;  %v2731_v60 = vld [vmem:[%s2563_s7 + $0x84] sm:$0xf] }
  0x32   : > { %v2237_v57 = vor.u32 %v2721_v52, %v2718_v48  ;;  %1501 = vmatpush.bf16.msra.mxu3 %v2265_v31  ;;  %v2177_v62 = vor.u32 %v2304_v58, %v2174_v59  ;;  %v2238_v63 = vld [vmem:[%s2563_s7 + $0x88] sm:$0xf0]  ;;  %v295_v0 = vmax.f32 %v263_v35, 0.0  ;;  %v296_v7 = vmax.f32 %v264_v36, 0.0  ;;  %s163_s14 = sld [smem:[#allocation2 + %s162_s8]]  ;;  %s148_s16 = sand.u32 1, %s2462_s10  }
  0x33   : > { %v2740_v8 = vadd.s32 240, %v2551_v1  ;;  %v2241_v9 = vor.u32 %v2731_v60, %v2238_v63  ;;  %v2744_v10 = vadd.s32 248, %v2551_v1  ;;  %v2747_v11 = vadd.s32 112, %v2551_v1  ;;  %s2166_s17 = sshll.u32 %s148_s16, 9  ;;  %s2336_s22 = sshll.u32 %s2511_s13, 9 }
  0x34   : > { %v2750_v12 = vadd.s32 120, %v2551_v1  ;;  %1235 = vmatpush.bf16.msra.mxu0 %v2189_v4  ;;  %v327_v13 = vmin.f32 %v295_v0, 255.0  ;;  %v328_v14 = vmin.f32 %v296_v7, 255.0  ;;  %v297_v16 = vmax.f32 %v2689_v2, 0.0  ;;  %s3342_s21 = scalar_lea.vmem [#allocation5], %s2166_s17  ;;  %s2082_s25 = scalar_lea.hbm %s3476_s2, %s2336_s22 }
  0x35   : > { %v3480_v15 = vcvt.s32.f32 %v2740_v8  ;;  %1324 = vmatpush.bf16.msra.mxu1 %v2253_v37  ;;  %1413 = vmatpush.bf16.msra.mxu2 %v2193_v38  ;;  %v3479_v17 = vcvt.s32.f32 %v2744_v10  ;;  %v211_v19 = vcvt.s32.f32 %v2747_v11  ;;  %v298_v21 = vmax.f32 %v2704_v42, 0.0  ;;  %s2083_s26 = sshll.u32 %s3342_s21, 4  ;;  %s2085_s27 = sshll.u32 %s2082_s25, 4  ;;  %s2084_s26 = int_to_ptr.vmem [resolvable:$true] %s2083_s26  ;;  %s2086_s27 = int_to_ptr.hbm [resolvable:$true] %s2085_s27 }
  0x36   : > { %v212_v20 = vcvt.s32.f32 %v2750_v12  ;;  %1502 = vmatpush.bf16.msra.mxu3 %v2257_v43  ;;  %v364_v22 = vsub.f32 %v327_v13, %v2672_v29  ;;  %v366_v23 = vsub.f32 %v328_v14, %v2672_v29  ;;  %v365_v24 = vsub.f32 %v327_v13, %v2675_v30  ;;  %s2071_s13 = scalar_lea.sflag [#allocation3], %s148_s16  ;;  %s2418_s28 = sshra.s32 %s2086_s27, 4  ;;  %s2419_s28 = int_to_ptr.hbm [resolvable:$true] %s2418_s28 }
  0x37   : > { %v367_v25 = vsub.f32 %v328_v14, %v2675_v30  ;;  %v651_v26 = vmul.f32 %v2734_v61, %v3480_v15  ;;  %v652_v27 = vmul.f32 %v2734_v61, %v3479_v17  ;;  %v635_v28 = vmul.f32 %v2734_v61, %v211_v19  ;;  %s2420_s29 = scalar_lea.hbm %s2419_s28, 512  ;;  %s2424_s4 = scalar_lea.hbm %s3476_s2, 1024 }
  0x38   : > { %v636_v31 = vmul.f32 %v2734_v61, %v212_v20  ;;  %1236 = vmatpush.bf16.msra.mxu0 %v2181_v44  ;;  %v428_v32 = vand.u32 2147483647, %v364_v22  ;;  %v430_v33 = vand.u32 2147483647, %v366_v23  ;;  %v429_v34 = vand.u32 2147483647, %v365_v24  ;;  %p2421_p0 = scmp.ne.s32.totalorder %s2419_s28, %s2420_s29  ;;  %p2425_p3 = scmp.lt.s32.totalorder %s2419_s28, %s3476_s2 }
  0x39   : > { %v2774_v35 = vstv %s163_s14  ;;  %1325 = vmatpush.bf16.msra.mxu1 %v2245_v45  ;;  %1414 = vmatpush.bf16.msra.mxu2 %v2185_v46  ;;  %v431_v36 = vand.u32 2147483647, %v367_v25  ;;  %v329_v7 = vmin.f32 %v297_v16, 255.0  ;;  %v330_v13 = vmin.f32 %v298_v21, 255.0  ;;  %p2426_p4 = scmp.lt.s32.totalorder %s2424_s4, %s2420_s29 }
  0x3a   : > { %v684_v2 = vadd.f32 %v2774_v35, %v651_v26  ;;  %v685_v4 = vadd.f32 %v2774_v35, %v652_v27  ;;  %v668_v37 = vadd.f32 %v2774_v35, %v635_v28  ;;  %1503 = vmatpush.bf16.msra.mxu3 %v2249_v53  ;;  %v492_v38 = vsub.f32 1.0, %v428_v32  ;;  %p2422_p1 = pnand %p2421_p0, %p2528_p5 }
  0x3b   : > { %v494_v39 = vsub.f32 1.0, %v430_v33  ;;  %v493_v40 = vsub.f32 1.0, %v429_v34  ;;  %v669_v41 = vadd.f32 %v2774_v35, %v636_v31  ;;  %v495_v42 = vsub.f32 1.0, %v431_v36  ;;  %p2427_p7 = por %p2426_p4, %p2425_p3 }
  0x3c   : > { %v716_v43 = vmax.f32 %v684_v2, 0.0  ;;  %v717_v44 = vmax.f32 %v685_v4, 0.0  ;;  %v700_v47 = vmax.f32 %v668_v37, 0.0  ;;  %1237 = vmatpush.bf16.msra.mxu0 %v2173_v54  ;;  %v556_v45 = vmax.f32 %v492_v38, 0.0  ;;  %p2423_p2 = pneg %p2422_p1 }
  0x3d   : > { %v558_v46 = vmax.f32 %v494_v39, 0.0  ;;  %v557_v48 = vmax.f32 %v493_v40, 0.0  ;;  %v701_v52 = vmax.f32 %v669_v41, 0.0  ;;  %1326 = vmatpush.bf16.msra.mxu1 %v2237_v57  ;;  %1415 = vmatpush.bf16.msra.mxu2 %v2177_v62  ;;  %v559_v58 = vmax.f32 %v495_v42, 0.0 }
  0x3e   : > { %v748_v59 = vmin.f32 %v716_v43, 255.0  ;;  %v749_v60 = vmin.f32 %v717_v44, 255.0  ;;  %v732_v53 = vmin.f32 %v700_v47, 255.0  ;;  %1504 = vmatpush.bf16.msra.mxu3 %v2241_v9  ;;  %v2787_v9 = vadd.s32 32, %v2551_v1  ;;  %p2428_p8 = pnand %p2427_p7, %p2423_p2 }
  0x3f   : > { %v1006_v63 = vpack.c.bf16 %v558_v46, %v556_v45  ;;  %v733_v0 = vmin.f32 %v701_v52, 255.0  ;;  %v1007_v14 = vpack.c.bf16 %v559_v58, %v557_v48  ;;  %v368_v58 = vsub.f32 %v329_v7, %v2672_v29 }
  0x40   : > { %v810_v22 = vsub.f32 %v748_v59, %v2672_v29  ;;  %v812_v54 = vsub.f32 %v749_v60, %v2672_v29  ;;  %v811_v23 = vsub.f32 %v748_v59, %v2675_v30  ;;  %v813_v57 = vsub.f32 %v749_v60, %v2675_v30 }
  0x41   : > { %1238 = vmatmul.bf16.vlgmr.msra.gmra.mxu0 %v1006_v63  ;;  %1416 = vmatmul.bf16.vlgmr.msra.gmra.mxu2 %v1006_v63  ;;  %v778_v62 = vsub.f32 %v732_v53, %v2672_v29  ;;  %v780_v24 = vsub.f32 %v733_v0, %v2672_v29  ;;  %v779_v26 = vsub.f32 %v732_v53, %v2675_v30  ;;  %v2986_v11 = vadd.s32 128, %v2551_v1 }
  0x42   : > { %1327 = vmatmul.bf16.vlgmr.msra.gmra.mxu1 %v1007_v14  ;;  %1505 = vmatmul.bf16.vlgmr.msra.gmra.mxu3 %v1007_v14  ;;  %v874_v16 = vand.u32 2147483647, %v810_v22  ;;  %v876_v21 = vand.u32 2147483647, %v812_v54  ;;  %v875_v25 = vand.u32 2147483647, %v811_v23  ;;  %v781_v32 = vsub.f32 %v733_v0, %v2675_v30 }
  0x43   : > { %v877_v27 = vand.u32 2147483647, %v813_v57  ;;  %v842_v28 = vand.u32 2147483647, %v778_v62  ;;  %v844_v31 = vand.u32 2147483647, %v780_v24  ;;  %v370_v59 = vsub.f32 %v330_v13, %v2672_v29 }
  0x44   : > { %v938_v33 = vsub.f32 1.0, %v874_v16  ;;  %v940_v34 = vsub.f32 1.0, %v876_v21  ;;  %v939_v36 = vsub.f32 1.0, %v875_v25  ;;  %v843_v2 = vand.u32 2147483647, %v779_v26 }
  0x45   : > { %v941_v4 = vsub.f32 1.0, %v877_v27  ;;  %v906_v37 = vsub.f32 1.0, %v842_v28  ;;  %v908_v38 = vsub.f32 1.0, %v844_v31  ;;  %v845_v39 = vand.u32 2147483647, %v781_v32 }
  0x46   : > { %v1002_v40 = vmax.f32 %v938_v33, 0.0  ;;  %v1004_v41 = vmax.f32 %v940_v34, 0.0  ;;  %v1003_v42 = vmax.f32 %v939_v36, 0.0  ;;  %v907_v43 = vsub.f32 1.0, %v843_v2 }
  0x47   : > { %v1005_v44 = vmax.f32 %v941_v4, 0.0  ;;  %v970_v47 = vmax.f32 %v906_v37, 0.0  ;;  %v972_v45 = vmax.f32 %v908_v38, 0.0  ;;  %v909_v46 = vsub.f32 1.0, %v845_v39 }
  0x48   : > { %v1648_v48 = vpack.c.bf16 %v1004_v41, %v1002_v40  ;;  %v971_v52 = vmax.f32 %v907_v43, 0.0  ;;  %v369_v0 = vsub.f32 %v329_v7, %v2675_v30  ;;  %v432_v14 = vand.u32 2147483647, %v368_v58 }
  0x49   : > { %v1649_v60 = vpack.c.bf16 %v1005_v44, %v1003_v42  ;;  %v1632_v53 = vpack.c.bf16 %v972_v45, %v970_v47  ;;  %v973_v63 = vmax.f32 %v909_v46, 0.0  ;;  %v434_v22 = vand.u32 2147483647, %v370_v59 }
  0x4a   : > { %1828 = vmatpush.bf16.xpose.msrb.mxu2 %v1648_v48  ;;  %v371_v54 = vsub.f32 %v330_v13, %v2675_v30  ;;  %v2796_v23 = vadd.s32 40, %v2551_v1  ;;  %v433_v62 = vand.u32 2147483647, %v369_v0  ;;  %v201_v24 = vcvt.s32.f32 %v2787_v9 }
  0x4b   : > { %1917 = vmatpush.bf16.xpose.msrb.mxu3 %v1649_v60  ;;  %1650 = vmatpush.bf16.xpose.msrb.mxu0 %v1632_v53  ;;  %v1633_v57 = vpack.c.bf16 %v973_v63, %v971_v52  ;;  %v2800_v16 = vadd.s32 224, %v2551_v1  ;;  %v496_v21 = vsub.f32 1.0, %v432_v14  ;;  %v498_v25 = vsub.f32 1.0, %v434_v22 }
  0x4c   : > { %v435_v7 = vand.u32 2147483647, %v371_v54  ;;  %v202_v26 = vcvt.s32.f32 %v2796_v23  ;;  %v497_v27 = vsub.f32 1.0, %v433_v62  ;;  %v234_v13 = vmul.f32 %v2615_v55, %v201_v24 }
  0x4d   : > { %1739 = vmatpush.bf16.xpose.msrb.mxu1 %v1633_v57  ;;  %v2807_v28 = vadd.s32 232, %v2551_v1  ;;  %v3482_v31 = vcvt.s32.f32 %v2800_v16  ;;  %v560_v32 = vmax.f32 %v496_v21, 0.0  ;;  %v562_v33 = vmax.f32 %v498_v25, 0.0 }
  0x4e   : > { %v499_v34 = vsub.f32 1.0, %v435_v7  ;;  %v235_v36 = vmul.f32 %v2615_v55, %v202_v26  ;;  %v561_v2 = vmax.f32 %v497_v27, 0.0  ;;  %v267_v4 = vadd.f32 %v2650_v18, %v234_v13 }
  0x4f   : > { %v3481_v37 = vcvt.s32.f32 %v2807_v28  ;;  %v649_v38 = vmul.f32 %v2734_v61, %v3482_v31  ;;  %v1008_v39 = vpack.c.bf16 %v562_v33, %v560_v32  ;;  %v2820_v42 = vadd.s32 96, %v2551_v1 }
  0x50   : > { %v563_v40 = vmax.f32 %v499_v34, 0.0  ;;  %v268_v41 = vadd.f32 %v2650_v18, %v235_v36  ;;  %v299_v43 = vmax.f32 %v267_v4, 0.0  ;;  %v2827_v45 = vadd.s32 104, %v2551_v1 }
  0x51   : > { %v650_v44 = vmul.f32 %v2734_v61, %v3481_v37  ;;  %v682_v47 = vadd.f32 %v2774_v35, %v649_v38  ;;  %1243 = vmatmul.bf16.gmra.mxu0 %v1008_v39  ;;  %1421 = vmatmul.bf16.gmra.mxu2 %v1008_v39  ;;  %v209_v52 = vcvt.s32.f32 %v2820_v42  ;;  %v2831_v58 = vadd.s32 48, %v2551_v1 }
  0x52   : > { %v1009_v46 = vpack.c.bf16 %v563_v40, %v561_v2  ;;  %v300_v48 = vmax.f32 %v268_v41, 0.0  ;;  %v331_v59 = vmin.f32 %v299_v43, 255.0  ;;  %v210_v63 = vcvt.s32.f32 %v2827_v45 }
  0x53   : > { %v683_v60 = vadd.f32 %v2774_v35, %v650_v44  ;;  %v714_v53 = vmax.f32 %v682_v47, 0.0  ;;  %v633_v14 = vmul.f32 %v2734_v61, %v209_v52  ;;  %v2839_v22 = vadd.s32 56, %v2551_v1 }
  0x54   : > { %1332 = vmatmul.bf16.gmra.mxu1 %v1009_v46  ;;  %1510 = vmatmul.bf16.gmra.mxu3 %v1009_v46  ;;  %v332_v0 = vmin.f32 %v300_v48, 255.0  ;;  %v203_v54 = vcvt.s32.f32 %v2831_v58  ;;  %v372_v57 = vsub.f32 %v331_v59, %v2672_v29  ;;  %v373_v62 = vsub.f32 %v331_v59, %v2675_v30 }
  0x55   : > { %v715_v21 = vmax.f32 %v683_v60, 0.0  ;;  %v746_v25 = vmin.f32 %v714_v53, 255.0  ;;  %v634_v13 = vmul.f32 %v2734_v61, %v210_v63  ;;  %v666_v32 = vadd.f32 %v2774_v35, %v633_v14 }
  0x56   : > { %v374_v7 = vsub.f32 %v332_v0, %v2672_v29  ;;  %v375_v27 = vsub.f32 %v332_v0, %v2675_v30  ;;  %v436_v33 = vand.u32 2147483647, %v372_v57  ;;  %v437_v34 = vand.u32 2147483647, %v373_v62 }
  0x57   : > { %v747_v36 = vmin.f32 %v715_v21, 255.0  ;;  %v806_v2 = vsub.f32 %v746_v25, %v2672_v29  ;;  %v807_v39 = vsub.f32 %v746_v25, %v2675_v30  ;;  %v667_v40 = vadd.f32 %v2774_v35, %v634_v13 }
  0x58   : > { %v438_v4 = vand.u32 2147483647, %v374_v7  ;;  %v439_v38 = vand.u32 2147483647, %v375_v27  ;;  %v500_v41 = vsub.f32 1.0, %v436_v33  ;;  %v501_v43 = vsub.f32 1.0, %v437_v34 }
  0x59   : > { %v808_v44 = vsub.f32 %v747_v36, %v2672_v29  ;;  %v870_v47 = vand.u32 2147483647, %v806_v2  ;;  %v809_v59 = vsub.f32 %v747_v36, %v2675_v30  ;;  %v871_v60 = vand.u32 2147483647, %v807_v39 }
  0x5a   : > { %v502_v46 = vsub.f32 1.0, %v438_v4  ;;  %v503_v48 = vsub.f32 1.0, %v439_v38  ;;  %v564_v53 = vmax.f32 %v500_v41, 0.0  ;;  %v565_v0 = vmax.f32 %v501_v43, 0.0 }
  0x5b   : > { %v872_v14 = vand.u32 2147483647, %v808_v44  ;;  %v934_v57 = vsub.f32 1.0, %v870_v47  ;;  %v873_v7 = vand.u32 2147483647, %v809_v59  ;;  %v935_v25 = vsub.f32 1.0, %v871_v60 }
  0x5c   : > { %v566_v62 = vmax.f32 %v502_v46, 0.0  ;;  %v567_v21 = vmax.f32 %v503_v48, 0.0  ;;  %v698_v33 = vmax.f32 %v666_v32, 0.0  ;;  %v699_v34 = vmax.f32 %v667_v40, 0.0 }
  0x5d   : > { %v936_v27 = vsub.f32 1.0, %v872_v14  ;;  %v998_v13 = vmax.f32 %v934_v57, 0.0  ;;  %v937_v2 = vsub.f32 1.0, %v873_v7  ;;  %v999_v4 = vmax.f32 %v935_v25, 0.0 }
  0x5e   : > { %v1010_v50 = vpack.c.bf16 %v566_v62, %v564_v53  ;;  %v1011_v49 = vpack.c.bf16 %v567_v21, %v565_v0  ;;  %v730_v17 = vmin.f32 %v698_v33, 255.0  ;;  %v731_v36 = vmin.f32 %v699_v34, 255.0 }
  0x5f   : > { %v1000_v38 = vmax.f32 %v936_v27, 0.0  ;;  %v204_v39 = vcvt.s32.f32 %v2839_v22  ;;  %v1001_v41 = vmax.f32 %v937_v2, 0.0  ;;  %v236_v43 = vmul.f32 %v2615_v55, %v203_v54 }
  0x60   : > { %v2860_v44 = vadd.s32 64, %v2551_v1  ;;  %v2863_v32 = vadd.s32 72, %v2551_v1  ;;  %v774_v47 = vsub.f32 %v730_v17, %v2672_v29  ;;  %v776_v46 = vsub.f32 %v731_v36, %v2672_v29 }
  0x61   : > { %v1646_v40 = vpack.c.bf16 %v1000_v38, %v998_v13  ;;  %v775_v48 = vsub.f32 %v730_v17, %v2675_v30  ;;  %1248 = vmatmul.bf16.gmra.mxu0 %v1010_v50  ;;  %1426 = vmatmul.bf16.gmra.mxu2 %v1010_v50  ;;  %v1647_v59 = vpack.c.bf16 %v1001_v41, %v999_v4 }
  0x62   : > { %v777_v60 = vsub.f32 %v731_v36, %v2675_v30  ;;  %v237_v53 = vmul.f32 %v2615_v55, %v204_v39  ;;  %v205_v0 = vcvt.s32.f32 %v2860_v44  ;;  %v838_v14 = vand.u32 2147483647, %v774_v47 }
  0x63   : > { %1829 = vmatpush.bf16.xpose.msrb.mxu2 %v1646_v40  ;;  %v840_v57 = vand.u32 2147483647, %v776_v46  ;;  %v839_v62 = vand.u32 2147483647, %v775_v48  ;;  %v269_v21 = vadd.f32 %v2650_v18, %v236_v43  ;;  %v206_v7 = vcvt.s32.f32 %v2863_v32  ;;  %1918 = vmatpush.bf16.xpose.msrb.mxu3 %v1647_v59 }
  0x64   : > { %1337 = vmatmul.bf16.gmra.mxu1 %v1011_v49  ;;  %1515 = vmatmul.bf16.gmra.mxu3 %v1011_v49  ;;  %v841_v17 = vand.u32 2147483647, %v777_v60  ;;  %v270_v50 = vadd.f32 %v2650_v18, %v237_v53  ;;  %v238_v25 = vmul.f32 %v2615_v55, %v205_v0  ;;  %v902_v27 = vsub.f32 1.0, %v838_v14 }
  0x65   : > { %v904_v13 = vsub.f32 1.0, %v840_v57  ;;  %v903_v33 = vsub.f32 1.0, %v839_v62  ;;  %v301_v34 = vmax.f32 %v269_v21, 0.0  ;;  %v239_v49 = vmul.f32 %v2615_v55, %v206_v7 }
  0x66   : > { %v905_v2 = vsub.f32 1.0, %v841_v17  ;;  %v302_v4 = vmax.f32 %v270_v50, 0.0  ;;  %v271_v38 = vadd.f32 %v2650_v18, %v238_v25  ;;  %v966_v36 = vmax.f32 %v902_v27, 0.0 }
  0x67   : > { %v968_v41 = vmax.f32 %v904_v13, 0.0  ;;  %v967_v43 = vmax.f32 %v903_v33, 0.0  ;;  %v333_v40 = vmin.f32 %v301_v34, 255.0  ;;  %v272_v48 = vadd.f32 %v2650_v18, %v239_v49 }
  0x68   : > { %v969_v47 = vmax.f32 %v905_v2, 0.0  ;;  %v334_v46 = vmin.f32 %v302_v4, 255.0  ;;  %v303_v59 = vmax.f32 %v271_v38, 0.0  ;;  %v2887_v57 = vadd.s32 208, %v2551_v1 }
  0x69   : > { %v1630_v60 = vpack.c.bf16 %v968_v41, %v966_v36  ;;  %v376_v53 = vsub.f32 %v333_v40, %v2672_v29  ;;  %v377_v14 = vsub.f32 %v333_v40, %v2675_v30  ;;  %v304_v50 = vmax.f32 %v272_v48, 0.0 }
  0x6a   : > { %v1631_v62 = vpack.c.bf16 %v969_v47, %v967_v43  ;;  %v378_v21 = vsub.f32 %v334_v46, %v2672_v29  ;;  %v379_v17 = vsub.f32 %v334_v46, %v2675_v30  ;;  %v335_v13 = vmin.f32 %v303_v59, 255.0 }
  0x6b   : > { %1651 = vmatpush.bf16.xpose.msrb.mxu0 %v1630_v60  ;;  %v440_v25 = vand.u32 2147483647, %v376_v53  ;;  %v441_v27 = vand.u32 2147483647, %v377_v14  ;;  %v2892_v33 = vadd.s32 216, %v2551_v1  ;;  %v336_v4 = vmin.f32 %v304_v50, 255.0 }
  0x6c   : > { %1740 = vmatpush.bf16.xpose.msrb.mxu1 %v1631_v62  ;;  %v442_v34 = vand.u32 2147483647, %v378_v21  ;;  %v443_v2 = vand.u32 2147483647, %v379_v17  ;;  %v3486_v49 = vcvt.s32.f32 %v2887_v57  ;;  %v380_v41 = vsub.f32 %v335_v13, %v2672_v29 }
  0x6d   : > { %v504_v38 = vsub.f32 1.0, %v440_v25  ;;  %v505_v36 = vsub.f32 1.0, %v441_v27  ;;  %v381_v43 = vsub.f32 %v335_v13, %v2675_v30  ;;  %v382_v46 = vsub.f32 %v336_v4, %v2672_v29 }
  0x6e   : > { %v506_v40 = vsub.f32 1.0, %v442_v34  ;;  %v507_v47 = vsub.f32 1.0, %v443_v2  ;;  %v383_v48 = vsub.f32 %v336_v4, %v2675_v30  ;;  %v444_v53 = vand.u32 2147483647, %v380_v41 }
  0x6f   : > { %v568_v59 = vmax.f32 %v504_v38, 0.0  ;;  %v569_v60 = vmax.f32 %v505_v36, 0.0  ;;  %v445_v14 = vand.u32 2147483647, %v381_v43  ;;  %v446_v17 = vand.u32 2147483647, %v382_v46 }
  0x70   : > { %v570_v62 = vmax.f32 %v506_v40, 0.0  ;;  %v571_v21 = vmax.f32 %v507_v47, 0.0  ;;  %v447_v50 = vand.u32 2147483647, %v383_v48  ;;  %v508_v25 = vsub.f32 1.0, %v444_v53 }
  0x71   : > { %v509_v27 = vsub.f32 1.0, %v445_v14  ;;  %v3485_v15 = vcvt.s32.f32 %v2892_v33  ;;  %v647_v13 = vmul.f32 %v2734_v61, %v3486_v49  ;;  %v510_v37 = vsub.f32 1.0, %v446_v17 }
  0x72   : > { %v1012_v34 = vpack.c.bf16 %v570_v62, %v568_v59  ;;  %v1013_v2 = vpack.c.bf16 %v571_v21, %v569_v60  ;;  %v511_v4 = vsub.f32 1.0, %v447_v50  ;;  %v572_v38 = vmax.f32 %v508_v25, 0.0 }
  0x73   : > { %v573_v36 = vmax.f32 %v509_v27, 0.0  ;;  %v648_v41 = vmul.f32 %v2734_v61, %v3485_v15  ;;  %v680_v43 = vadd.f32 %v2774_v35, %v647_v13  ;;  %v574_v40 = vmax.f32 %v510_v37, 0.0 }
  0x74   : > { %1253 = vmatmul.bf16.gmra.mxu0 %v1012_v34  ;;  %1342 = vmatmul.bf16.gmra.mxu1 %v1013_v2  ;;  %v575_v47 = vmax.f32 %v511_v4, 0.0  ;;  %v175_v46 = vadd.s32 80, %v2551_v1  ;;  %v176_v48 = vadd.s32 88, %v2551_v1  ;;  %v242_v53 = vmul.f32 %v2615_v55, %v209_v52 }
  0x75   : > { %1431 = vmatmul.bf16.gmra.mxu2 %v1012_v34  ;;  %1520 = vmatmul.bf16.gmra.mxu3 %v1013_v2  ;;  %v681_v59 = vadd.f32 %v2774_v35, %v648_v41  ;;  %v712_v60 = vmax.f32 %v680_v43, 0.0  ;;  %v243_v14 = vmul.f32 %v2615_v55, %v210_v63  ;;  %v1014_v62 = vpack.c.bf16 %v574_v40, %v572_v38 }
  0x76   : > { %v1015_v37 = vpack.c.bf16 %v575_v47, %v573_v36  ;;  %v207_v21 = vcvt.s32.f32 %v175_v46  ;;  %v208_v17 = vcvt.s32.f32 %v176_v48  ;;  %v2917_v27 = vadd.f32 %v2650_v18, %v242_v53 }
  0x77   : > { %v713_v50 = vmax.f32 %v681_v59, 0.0  ;;  %v744_v25 = vmin.f32 %v712_v60, 255.0  ;;  %v2920_v13 = vadd.f32 %v2650_v18, %v243_v14 }
  0x78   : > { %v631_v42 = vmul.f32 %v2734_v61, %v207_v21  ;;  %v632_v52 = vmul.f32 %v2734_v61, %v208_v17  ;;  %v240_v45 = vmul.f32 %v2615_v55, %v207_v21  ;;  %v241_v63 = vmul.f32 %v2615_v55, %v208_v17 }
  0x79   : > { %v745_v34 = vmin.f32 %v713_v50, 255.0  ;;  %v802_v2 = vsub.f32 %v744_v25, %v2672_v29  ;;  %v803_v4 = vsub.f32 %v744_v25, %v2675_v30  ;;  %v307_v38 = vmax.f32 %v2917_v27, 0.0 }
  0x7a   : > { %v664_v36 = vadd.f32 %v2774_v35, %v631_v42  ;;  %v665_v41 = vadd.f32 %v2774_v35, %v632_v52  ;;  %v273_v43 = vadd.f32 %v2650_v18, %v240_v45  ;;  %v274_v40 = vadd.f32 %v2650_v18, %v241_v63 }
  0x7b   : > { %v804_v47 = vsub.f32 %v745_v34, %v2672_v29  ;;  %v866_v46 = vand.u32 2147483647, %v802_v2  ;;  %v805_v48 = vsub.f32 %v745_v34, %v2675_v30  ;;  %v867_v59 = vand.u32 2147483647, %v803_v4 }
  0x7c   : > { %v696_v60 = vmax.f32 %v664_v36, 0.0  ;;  %v697_v53 = vmax.f32 %v665_v41, 0.0  ;;  %v305_v14 = vmax.f32 %v273_v43, 0.0  ;;  %v306_v21 = vmax.f32 %v274_v40, 0.0 }
  0x7d   : > { %v868_v17 = vand.u32 2147483647, %v804_v47  ;;  %v930_v50 = vsub.f32 1.0, %v866_v46  ;;  %v869_v25 = vand.u32 2147483647, %v805_v48  ;;  %v931_v42 = vsub.f32 1.0, %v867_v59 }
  0x7e   : > { %v728_v31 = vmin.f32 %v696_v60, 255.0  ;;  %v729_v52 = vmin.f32 %v697_v53, 255.0  ;;  %v337_v56 = vmin.f32 %v305_v14, 255.0  ;;  %v338_v45 = vmin.f32 %v306_v21, 255.0 }
  0x7f   : > { %v932_v51 = vsub.f32 1.0, %v868_v17  ;;  %v994_v63 = vmax.f32 %v930_v50, 0.0  ;;  %v933_v15 = vsub.f32 1.0, %v869_v25  ;;  %v995_v49 = vmax.f32 %v931_v42, 0.0 }
  0x80   : > { %v770_v2 = vsub.f32 %v728_v31, %v2672_v29  ;;  %v772_v34 = vsub.f32 %v729_v52, %v2672_v29  ;;  %v771_v4 = vsub.f32 %v728_v31, %v2675_v30  ;;  %v773_v36 = vsub.f32 %v729_v52, %v2675_v30 }
  0x81   : > { %v996_v41 = vmax.f32 %v932_v51, 0.0  ;;  %v997_v43 = vmax.f32 %v933_v15, 0.0  ;;  %v384_v40 = vsub.f32 %v337_v56, %v2672_v29  ;;  %v386_v47 = vsub.f32 %v338_v45, %v2672_v29 }
  0x82   : > { %v834_v46 = vand.u32 2147483647, %v770_v2  ;;  %v836_v48 = vand.u32 2147483647, %v772_v34  ;;  %v835_v59 = vand.u32 2147483647, %v771_v4  ;;  %v385_v60 = vsub.f32 %v337_v56, %v2675_v30 }
  0x83   : > { %v1644_v53 = vpack.c.bf16 %v996_v41, %v994_v63  ;;  %v1645_v14 = vpack.c.bf16 %v997_v43, %v995_v49  ;;  %v837_v21 = vand.u32 2147483647, %v773_v36  ;;  %v448_v17 = vand.u32 2147483647, %v384_v40 }
  0x84   : > { %1258 = vmatmul.bf16.gmra.mxu0 %v1014_v62  ;;  %1347 = vmatmul.bf16.gmra.mxu1 %v1015_v37  ;;  %v898_v31 = vsub.f32 1.0, %v834_v46  ;;  %v900_v50 = vsub.f32 1.0, %v836_v48  ;;  %v899_v25 = vsub.f32 1.0, %v835_v59  ;;  %v450_v51 = vand.u32 2147483647, %v386_v47 }
  0x85   : > { %1436 = vmatmul.bf16.gmra.mxu2 %v1014_v62  ;;  %1525 = vmatmul.bf16.gmra.mxu3 %v1015_v37  ;;  %v901_v15 = vsub.f32 1.0, %v837_v21  ;;  %v512_v42 = vsub.f32 1.0, %v448_v17  ;;  %v387_v52 = vsub.f32 %v338_v45, %v2675_v30  ;;  %v449_v2 = vand.u32 2147483647, %v385_v60 }
  0x86   : > { %1830 = vmatpush.bf16.xpose.msrb.mxu2 %v1644_v53  ;;  %1919 = vmatpush.bf16.xpose.msrb.mxu3 %v1645_v14  ;;  %v962_v56 = vmax.f32 %v898_v31, 0.0  ;;  %v964_v63 = vmax.f32 %v900_v50, 0.0  ;;  %v963_v49 = vmax.f32 %v899_v25, 0.0  ;;  %v514_v34 = vsub.f32 1.0, %v450_v51 }
  0x87   : > { %v965_v4 = vmax.f32 %v901_v15, 0.0  ;;  %v576_v36 = vmax.f32 %v512_v42, 0.0  ;;  %v451_v41 = vand.u32 2147483647, %v387_v52  ;;  %v513_v43 = vsub.f32 1.0, %v449_v2 }
  0x88   : > { %v1628_v40 = vpack.c.bf16 %v964_v63, %v962_v56  ;;  %v578_v46 = vmax.f32 %v514_v34, 0.0  ;;  %v308_v62 = vmax.f32 %v2920_v13, 0.0  ;;  %v339_v37 = vmin.f32 %v307_v38, 255.0 }
  0x89   : > { %v1629_v47 = vpack.c.bf16 %v965_v4, %v963_v49  ;;  %v515_v45 = vsub.f32 1.0, %v451_v41  ;;  %v577_v48 = vmax.f32 %v513_v43, 0.0  ;;  %v2947_v59 = vadd.s32 192, %v2551_v1 }
  0x8a   : > { %1652 = vmatpush.bf16.xpose.msrb.mxu0 %v1628_v40  ;;  %v1016_v60 = vpack.c.bf16 %v578_v46, %v576_v36  ;;  %v340_v53 = vmin.f32 %v308_v62, 255.0  ;;  %v388_v14 = vsub.f32 %v339_v37, %v2672_v29  ;;  %v389_v21 = vsub.f32 %v339_v37, %v2675_v30 }
  0x8b   : > { %1741 = vmatpush.bf16.xpose.msrb.mxu1 %v1629_v47  ;;  %v579_v17 = vmax.f32 %v515_v45, 0.0  ;;  %v2952_v13 = vadd.s32 200, %v2551_v1  ;;  %v3492_v27 = vcvt.s32.f32 %v2947_v59  ;;  %v629_v38 = vmul.f32 %v2734_v61, %v205_v0 }
  0x8c   : > { %v390_v31 = vsub.f32 %v340_v53, %v2672_v29  ;;  %v452_v50 = vand.u32 2147483647, %v388_v14  ;;  %v391_v25 = vsub.f32 %v340_v53, %v2675_v30  ;;  %v453_v51 = vand.u32 2147483647, %v389_v21 }
  0x8d   : > { %v1017_v15 = vpack.c.bf16 %v579_v17, %v577_v48  ;;  %v3491_v42 = vcvt.s32.f32 %v2952_v13  ;;  %v645_v52 = vmul.f32 %v2734_v61, %v3492_v27  ;;  %v630_v2 = vmul.f32 %v2734_v61, %v206_v7 }
  0x8e   : > { %v454_v44 = vand.u32 2147483647, %v390_v31  ;;  %v516_v56 = vsub.f32 1.0, %v452_v50  ;;  %v455_v0 = vand.u32 2147483647, %v391_v25  ;;  %v517_v63 = vsub.f32 1.0, %v453_v51 }
  0x8f   : > { %v646_v49 = vmul.f32 %v2734_v61, %v3491_v42  ;;  %v678_v34 = vadd.f32 %v2774_v35, %v645_v52  ;;  %v662_v4 = vadd.f32 %v2774_v35, %v629_v38  ;;  %v663_v36 = vadd.f32 %v2774_v35, %v630_v2 }
  0x90   : > { %v518_v41 = vsub.f32 1.0, %v454_v44  ;;  %v580_v43 = vmax.f32 %v516_v56, 0.0  ;;  %v519_v40 = vsub.f32 1.0, %v455_v0  ;;  %v581_v32 = vmax.f32 %v517_v63, 0.0 }
  0x91   : > { %v679_v7 = vadd.f32 %v2774_v35, %v646_v49  ;;  %v710_v46 = vmax.f32 %v678_v34, 0.0  ;;  %v694_v62 = vmax.f32 %v662_v4, 0.0  ;;  %v695_v37 = vmax.f32 %v663_v36, 0.0 }
  0x92   : > { %v582_v47 = vmax.f32 %v518_v41, 0.0  ;;  %v583_v45 = vmax.f32 %v519_v40, 0.0  ;;  %v244_v48 = vmul.f32 %v2615_v55, %v211_v19  ;;  %v245_v53 = vmul.f32 %v2615_v55, %v212_v20 }
  0x93   : > { %v711_v14 = vmax.f32 %v679_v7, 0.0  ;;  %v742_v21 = vmin.f32 %v710_v46, 255.0  ;;  %v726_v17 = vmin.f32 %v694_v62, 255.0  ;;  %v727_v38 = vmin.f32 %v695_v37, 255.0 }
  0x94   : > { %1263 = vmatmul.bf16.gmra.mxu0 %v1016_v60  ;;  %1352 = vmatmul.bf16.gmra.mxu1 %v1017_v15  ;;  %v2980_v31 = vpack.c.bf16 %v582_v47, %v580_v43  ;;  %v2982_v50 = vpack.c.bf16 %v583_v45, %v581_v32  ;;  %v277_v25 = vadd.f32 %v2650_v18, %v244_v48  ;;  %v3488_v36 = vcvt.s32.f32 %v2986_v11 }
  0x95   : > { %1441 = vmatmul.bf16.gmra.mxu2 %v1016_v60  ;;  %1530 = vmatmul.bf16.gmra.mxu3 %v1017_v15  ;;  %v743_v12 = vmin.f32 %v711_v14, 255.0  ;;  %v798_v19 = vsub.f32 %v742_v21, %v2672_v29  ;;  %v799_v20 = vsub.f32 %v742_v21, %v2675_v30  ;;  %v766_v51 = vsub.f32 %v726_v17, %v2672_v29 }
  0x96   : > { %v768_v52 = vsub.f32 %v727_v38, %v2672_v29  ;;  %v767_v2 = vsub.f32 %v726_v17, %v2675_v30  ;;  %v769_v44 = vsub.f32 %v727_v38, %v2675_v30  ;;  %v278_v56 = vadd.f32 %v2650_v18, %v245_v53 }
  0x97   : > { %v800_v0 = vsub.f32 %v743_v12, %v2672_v29  ;;  %v862_v63 = vand.u32 2147483647, %v798_v19  ;;  %v801_v60 = vsub.f32 %v743_v12, %v2675_v30  ;;  %v863_v15 = vand.u32 2147483647, %v799_v20 }
  0x98   : > { %v830_v49 = vand.u32 2147483647, %v766_v51  ;;  %v832_v34 = vand.u32 2147483647, %v768_v52  ;;  %v831_v4 = vand.u32 2147483647, %v767_v2 }
  0x99   : > { %v864_v41 = vand.u32 2147483647, %v800_v0  ;;  %v926_v43 = vsub.f32 1.0, %v862_v63  ;;  %v865_v40 = vand.u32 2147483647, %v801_v60  ;;  %v927_v32 = vsub.f32 1.0, %v863_v15 }
  0x9a   : > { %v894_v7 = vsub.f32 1.0, %v830_v49  ;;  %v896_v46 = vsub.f32 1.0, %v832_v34  ;;  %v833_v62 = vand.u32 2147483647, %v769_v44  ;;  %v895_v37 = vsub.f32 1.0, %v831_v4 }
  0x9b   : > { %v928_v47 = vsub.f32 1.0, %v864_v41  ;;  %v990_v45 = vmax.f32 %v926_v43, 0.0  ;;  %v929_v48 = vsub.f32 1.0, %v865_v40  ;;  %v991_v53 = vmax.f32 %v927_v32, 0.0 }
  0x9c   : > { %v958_v14 = vmax.f32 %v894_v7, 0.0  ;;  %v960_v21 = vmax.f32 %v896_v46, 0.0  ;;  %v897_v17 = vsub.f32 1.0, %v833_v62  ;;  %v959_v38 = vmax.f32 %v895_v37, 0.0 }
  0x9d   : > { %v992_v12 = vmax.f32 %v928_v47, 0.0  ;;  %v993_v19 = vmax.f32 %v929_v48, 0.0  ;;  %v309_v20 = vmax.f32 %v277_v25, 0.0  ;;  %v310_v51 = vmax.f32 %v278_v56, 0.0 }
  0x9e   : > { %v1626_v52 = vpack.c.bf16 %v960_v21, %v958_v14  ;;  %v961_v2 = vmax.f32 %v897_v17, 0.0  ;;  %v2999_v0 = vadd.s32 136, %v2551_v1  ;;  %v246_v44 = vmul.f32 %v2615_v55, %v3488_v36 }
  0x9f   : > { %v1642_v63 = vpack.c.bf16 %v992_v12, %v990_v45  ;;  %v1643_v60 = vpack.c.bf16 %v993_v19, %v991_v53  ;;  %v341_v15 = vmin.f32 %v309_v20, 255.0  ;;  %v342_v49 = vmin.f32 %v310_v51, 255.0 }
  0xa0   : > { %1653 = vmatpush.bf16.xpose.msrb.mxu0 %v1626_v52  ;;  %v1627_v34 = vpack.c.bf16 %v961_v2, %v959_v38  ;;  %v3487_v4 = vcvt.s32.f32 %v2999_v0  ;;  %v279_v25 = vadd.f32 %v2650_v18, %v246_v44  ;;  %v3007_v56 = vadd.s32 144, %v2551_v1 }
  0xa1   : > { %1831 = vmatpush.bf16.xpose.msrb.mxu2 %v1642_v63  ;;  %1920 = vmatpush.bf16.xpose.msrb.mxu3 %v1643_v60  ;;  %v392_v41 = vsub.f32 %v341_v15, %v2672_v29  ;;  %v394_v43 = vsub.f32 %v342_v49, %v2672_v29  ;;  %v393_v40 = vsub.f32 %v341_v15, %v2675_v30  ;;  %v3017_v62 = vadd.s32 152, %v2551_v1 }
  0xa2   : > { %1742 = vmatpush.bf16.xpose.msrb.mxu1 %v1627_v34  ;;  %v395_v32 = vsub.f32 %v342_v49, %v2675_v30  ;;  %v247_v7 = vmul.f32 %v2615_v55, %v3487_v4  ;;  %v311_v46 = vmax.f32 %v279_v25, 0.0  ;;  %v3490_v21 = vcvt.s32.f32 %v3007_v56 }
  0xa3   : > { %v456_v37 = vand.u32 2147483647, %v392_v41  ;;  %v458_v47 = vand.u32 2147483647, %v394_v43  ;;  %v457_v45 = vand.u32 2147483647, %v393_v40 }
  0xa4   : > { %1268 = vmatmul.bf16.gmra.mxu0 %v2980_v31  ;;  %1357 = vmatmul.bf16.gmra.mxu1 %v2982_v50  ;;  %v459_v48 = vand.u32 2147483647, %v395_v32  ;;  %v280_v53 = vadd.f32 %v2650_v18, %v247_v7  ;;  %v343_v14 = vmin.f32 %v311_v46, 255.0  ;;  %v3026_v19 = vadd.s32 176, %v2551_v1 }
  0xa5   : > { %1446 = vmatmul.bf16.gmra.mxu2 %v2980_v31  ;;  %1535 = vmatmul.bf16.gmra.mxu3 %v2982_v50  ;;  %v520_v17 = vsub.f32 1.0, %v456_v37  ;;  %v522_v38 = vsub.f32 1.0, %v458_v47  ;;  %v521_v12 = vsub.f32 1.0, %v457_v45  ;;  %v3031_v60 = vadd.s32 184, %v2551_v1 }
  0xa6   : > { %v523_v20 = vsub.f32 1.0, %v459_v48  ;;  %v312_v51 = vmax.f32 %v280_v53, 0.0  ;;  %v396_v52 = vsub.f32 %v343_v14, %v2672_v29  ;;  %v397_v2 = vsub.f32 %v343_v14, %v2675_v30 }
  0xa7   : > { %v584_v44 = vmax.f32 %v520_v17, 0.0  ;;  %v586_v63 = vmax.f32 %v522_v38, 0.0  ;;  %v3489_v31 = vcvt.s32.f32 %v3017_v62  ;;  %v585_v34 = vmax.f32 %v521_v12, 0.0 }
  0xa8   : > { %v344_v50 = vmin.f32 %v312_v51, 255.0  ;;  %v460_v15 = vand.u32 2147483647, %v396_v52  ;;  %v461_v49 = vand.u32 2147483647, %v397_v2  ;;  %v587_v25 = vmax.f32 %v523_v20, 0.0 }
  0xa9   : > { %v219_v41 = vcvt.s32.f32 %v3026_v19  ;;  %v220_v43 = vcvt.s32.f32 %v3031_v60  ;;  %v1020_v40 = vpack.c.bf16 %v586_v63, %v584_v44  ;;  %v248_v46 = vmul.f32 %v2615_v55, %v3490_v21 }
  0xaa   : > { %v398_v32 = vsub.f32 %v344_v50, %v2672_v29  ;;  %v399_v7 = vsub.f32 %v344_v50, %v2675_v30  ;;  %v627_v45 = vmul.f32 %v2734_v61, %v203_v54  ;;  %v249_v48 = vmul.f32 %v2615_v55, %v3489_v31 }
  0xab   : > { %v643_v37 = vmul.f32 %v2734_v61, %v219_v41  ;;  %v644_v47 = vmul.f32 %v2734_v61, %v220_v43  ;;  %v524_v14 = vsub.f32 1.0, %v460_v15  ;;  %v525_v17 = vsub.f32 1.0, %v461_v49 }
  0xac   : > { %v462_v53 = vand.u32 2147483647, %v398_v32  ;;  %v628_v38 = vmul.f32 %v2734_v61, %v204_v39  ;;  %v1021_v12 = vpack.c.bf16 %v587_v25, %v585_v34  ;;  %v660_v58 = vadd.f32 %v2774_v35, %v627_v45 }
  0xad   : > { %v676_v20 = vadd.f32 %v2774_v35, %v643_v37  ;;  %v677_v51 = vadd.f32 %v2774_v35, %v644_v47  ;;  %v463_v54 = vand.u32 2147483647, %v399_v7  ;;  %v281_v44 = vadd.f32 %v2650_v18, %v248_v46 }
  0xae   : > { %v526_v52 = vsub.f32 1.0, %v462_v53  ;;  %v661_v2 = vadd.f32 %v2774_v35, %v628_v38  ;;  %v692_v15 = vmax.f32 %v660_v58, 0.0  ;;  %v282_v22 = vadd.f32 %v2650_v18, %v249_v48 }
  0xaf   : > { %v708_v63 = vmax.f32 %v676_v20, 0.0  ;;  %v709_v50 = vmax.f32 %v677_v51, 0.0  ;;  %v3062_v49 = vmax.f32 %v524_v14, 0.0  ;;  %v3064_v39 = vmax.f32 %v525_v17, 0.0 }
  0xb0   : > { %v693_v34 = vmax.f32 %v661_v2, 0.0  ;;  %v313_v25 = vmax.f32 %v281_v44, 0.0  ;;  %v724_v47 = vmin.f32 %v692_v15, 255.0  ;;  %v314_v45 = vmax.f32 %v282_v22, 0.0 }
  0xb1   : > { %v740_v32 = vmin.f32 %v708_v63, 255.0  ;;  %v741_v37 = vmin.f32 %v709_v50, 255.0  ;;  %v590_v7 = vmax.f32 %v526_v52, 0.0  ;;  %v527_v53 = vsub.f32 1.0, %v463_v54 }
  0xb2   : > { %v725_v38 = vmin.f32 %v693_v34, 255.0  ;;  %v345_v4 = vmin.f32 %v313_v25, 255.0  ;;  %v762_v17 = vsub.f32 %v724_v47, %v2672_v29  ;;  %v763_v58 = vsub.f32 %v724_v47, %v2675_v30 }
  0xb3   : > { %v794_v46 = vsub.f32 %v740_v32, %v2672_v29  ;;  %v796_v20 = vsub.f32 %v741_v37, %v2672_v29  ;;  %v795_v48 = vsub.f32 %v740_v32, %v2675_v30  ;;  %v797_v14 = vsub.f32 %v741_v37, %v2675_v30 }
  0xb4   : > { %1273 = vmatmul.bf16.gmra.mxu0 %v1020_v40  ;;  %1362 = vmatmul.bf16.gmra.mxu1 %v1021_v12  ;;  %v764_v51 = vsub.f32 %v725_v38, %v2672_v29  ;;  %v346_v52 = vmin.f32 %v314_v45, 255.0  ;;  %v765_v63 = vsub.f32 %v725_v38, %v2675_v30  ;;  %v826_v15 = vand.u32 2147483647, %v762_v17 }
  0xb5   : > { %1451 = vmatmul.bf16.gmra.mxu2 %v1020_v40  ;;  %1540 = vmatmul.bf16.gmra.mxu3 %v1021_v12  ;;  %v858_v54 = vand.u32 2147483647, %v794_v46  ;;  %v860_v2 = vand.u32 2147483647, %v796_v20  ;;  %v859_v44 = vand.u32 2147483647, %v795_v48  ;;  %v400_v34 = vsub.f32 %v345_v4, %v2672_v29 }
  0xb6   : > { %v861_v50 = vand.u32 2147483647, %v797_v14  ;;  %v828_v22 = vand.u32 2147483647, %v764_v51  ;;  %v827_v36 = vand.u32 2147483647, %v763_v58 }
  0xb7   : > { %v922_v25 = vsub.f32 1.0, %v858_v54  ;;  %v924_v32 = vsub.f32 1.0, %v860_v2  ;;  %v923_v37 = vsub.f32 1.0, %v859_v44  ;;  %v890_v21 = vsub.f32 1.0, %v826_v15 }
  0xb8   : > { %v925_v31 = vsub.f32 1.0, %v861_v50  ;;  %v892_v47 = vsub.f32 1.0, %v828_v22  ;;  %v829_v45 = vand.u32 2147483647, %v765_v63  ;;  %v891_v20 = vsub.f32 1.0, %v827_v36 }
  0xb9   : > { %v986_v40 = vmax.f32 %v922_v25, 0.0  ;;  %v988_v12 = vmax.f32 %v924_v32, 0.0  ;;  %v987_v46 = vmax.f32 %v923_v37, 0.0  ;;  %v954_v42 = vmax.f32 %v890_v21, 0.0 }
  0xba   : > { %v989_v48 = vmax.f32 %v925_v31, 0.0  ;;  %v956_v38 = vmax.f32 %v892_v47, 0.0  ;;  %v893_v14 = vsub.f32 1.0, %v829_v45  ;;  %v591_v17 = vmax.f32 %v527_v53, 0.0 }
  0xbb   : > { %v1640_v51 = vpack.c.bf16 %v988_v12, %v986_v40  ;;  %v955_v27 = vmax.f32 %v891_v20, 0.0  ;;  %v402_v54 = vsub.f32 %v346_v52, %v2672_v29  ;;  %v401_v50 = vsub.f32 %v345_v4, %v2675_v30 }
  0xbc   : > { %v1641_v2 = vpack.c.bf16 %v989_v48, %v987_v46  ;;  %v1624_v44 = vpack.c.bf16 %v956_v38, %v954_v42  ;;  %v957_v58 = vmax.f32 %v893_v14, 0.0  ;;  %v403_v63 = vsub.f32 %v346_v52, %v2675_v30 }
  0xbd   : > { %1832 = vmatpush.bf16.xpose.msrb.mxu2 %v1640_v51  ;;  %v185_v15 = vadd.s32 160, %v2551_v1  ;;  %v464_v31 = vand.u32 2147483647, %v400_v34  ;;  %v466_v53 = vand.u32 2147483647, %v402_v54  ;;  %v186_v22 = vadd.s32 168, %v2551_v1 }
  0xbe   : > { %v1239_v36 = vpop.f32.mrf.mxu0  ;;  %1921 = vmatpush.bf16.xpose.msrb.mxu3 %v1641_v2  ;;  %1654 = vmatpush.bf16.xpose.msrb.mxu0 %v1624_v44  ;;  %v1625_v21 = vpack.c.bf16 %v957_v58, %v955_v27  ;;  %v1022_v32 = vpack.c.bf16 %v590_v7, %v3062_v49  ;;  %v1023_v42 = vpack.c.bf16 %v591_v17, %v3064_v39  ;;  %v465_v47 = vand.u32 2147483647, %v401_v50 }
  0xbf   : > { %v1328_v25 = vpop.f32.mrf.mxu1  ;;  %v217_v37 = vcvt.s32.f32 %v185_v15  ;;  %v467_v52 = vand.u32 2147483647, %v403_v63  ;;  %v218_v45 = vcvt.s32.f32 %v186_v22  ;;  %v528_v12 = vsub.f32 1.0, %v464_v31 }
  0xc0   : > { %v1329_v4 = vadd.f32 %v1328_v25, %v1239_v36  ;;  %1743 = vmatpush.bf16.xpose.msrb.mxu1 %v1625_v21  ;;  %v530_v46 = vsub.f32 1.0, %v466_v53  ;;  %v529_v49 = vsub.f32 1.0, %v465_v47  ;;  %v252_v51 = vmul.f32 %v2615_v55, %v219_v41 }
  0xc1   : > { %v250_v40 = vmul.f32 %v2615_v55, %v217_v37  ;;  %v251_v27 = vmul.f32 %v2615_v55, %v218_v45  ;;  %v531_v7 = vsub.f32 1.0, %v467_v52  ;;  %v641_v14 = vmul.f32 %v2734_v61, %v217_v37 }
  0xc2   : > { %v642_v17 = vmul.f32 %v2734_v61, %v218_v45  ;;  %v592_v44 = vmax.f32 %v528_v12, 0.0  ;;  %v594_v58 = vmax.f32 %v530_v46, 0.0  ;;  %v253_v31 = vmul.f32 %v2615_v55, %v220_v43 }
  0xc3   : > { %v283_v34 = vadd.f32 %v2650_v18, %v250_v40  ;;  %v284_v39 = vadd.f32 %v2650_v18, %v251_v27  ;;  %v674_v36 = vadd.f32 %v2774_v35, %v641_v14  ;;  %v593_v22 = vmax.f32 %v529_v49, 0.0 }
  0xc4   : > { %1278 = vmatmul.bf16.gmra.mxu0 %v1022_v32  ;;  %1367 = vmatmul.bf16.gmra.mxu1 %v1023_v42  ;;  %v1417_v20 = vpop.f32.mrf.mxu2  ;;  %v675_v21 = vadd.f32 %v2774_v35, %v642_v17  ;;  %v595_v19 = vmax.f32 %v531_v7, 0.0  ;;  %v286_v60 = vadd.f32 %v2650_v18, %v253_v31  ;;  %v1024_v43 = vpack.c.bf16 %v594_v58, %v592_v44 }
  0xc5   : > { %1456 = vmatmul.bf16.gmra.mxu2 %v1022_v32  ;;  %1545 = vmatmul.bf16.gmra.mxu3 %v1023_v42  ;;  %v1506_v48 = vpop.f32.mrf.mxu3  ;;  %v315_v38 = vmax.f32 %v283_v34, 0.0  ;;  %v316_v50 = vmax.f32 %v284_v39, 0.0  ;;  %v706_v41 = vmax.f32 %v674_v36, 0.0  ;;  %v285_v42 = vadd.f32 %v2650_v18, %v252_v51 }
  0xc6   : > { %v1507_v54 = vadd.f32 %v1506_v48, %v1417_v20  ;;  %v1241_v2 = vpop.f32.mrf.mxu0  ;;  %v707_v32 = vmax.f32 %v675_v21, 0.0  ;;  %v1025_v46 = vpack.c.bf16 %v595_v19, %v593_v22  ;;  %v625_v7 = vmul.f32 %v2734_v61, %v201_v24 }
  0xc7   : > { %v1330_v63 = vpop.f32.mrf.mxu1  ;;  %v347_v15 = vmin.f32 %v315_v38, 255.0  ;;  %v348_v25 = vmin.f32 %v316_v50, 255.0  ;;  %v738_v45 = vmin.f32 %v706_v41, 255.0  ;;  %v317_v39 = vmax.f32 %v285_v42, 0.0 }
  0xc8   : > { %v1331_v53 = vadd.f32 %v1330_v63, %v1241_v2  ;;  %v739_v40 = vmin.f32 %v707_v32, 255.0  ;;  %v626_v58 = vmul.f32 %v2734_v61, %v202_v26  ;;  %v318_v50 = vmax.f32 %v286_v60, 0.0 }
  0xc9   : > { %v404_v47 = vsub.f32 %v347_v15, %v2672_v29  ;;  %v405_v52 = vsub.f32 %v347_v15, %v2675_v30  ;;  %v406_v27 = vsub.f32 %v348_v25, %v2672_v29  ;;  %v407_v34 = vsub.f32 %v348_v25, %v2675_v30 }
  0xca   : > { %v3097_v37 = vpack.c.bf16 %v1331_v53, %v1329_v4  ;;  %v790_v49 = vsub.f32 %v738_v45, %v2672_v29  ;;  %v792_v4 = vsub.f32 %v739_v40, %v2672_v29  ;;  %v791_v17 = vsub.f32 %v738_v45, %v2675_v30 }
  0xcb   : > { %v468_v38 = vand.u32 2147483647, %v404_v47  ;;  %v469_v14 = vand.u32 2147483647, %v405_v52  ;;  %v470_v15 = vand.u32 2147483647, %v406_v27  ;;  %v793_v24 = vsub.f32 %v739_v40, %v2675_v30 }
  0xcc   : > { %v1419_v12 = vpop.f32.mrf.mxu2  ;;  %v854_v2 = vand.u32 2147483647, %v790_v49  ;;  %v856_v44 = vand.u32 2147483647, %v792_v4  ;;  %v471_v9 = vand.u32 2147483647, %v407_v34  ;;  %v658_v22 = vadd.f32 %v2774_v35, %v625_v7 }
  0xcd   : > { %v1508_v20 = vpop.f32.mrf.mxu3  ;;  %v855_v53 = vand.u32 2147483647, %v791_v17  ;;  %v532_v25 = vsub.f32 1.0, %v468_v38  ;;  %v533_v41 = vsub.f32 1.0, %v469_v14  ;;  %v857_v32 = vand.u32 2147483647, %v793_v24 }
  0xce   : > { %v1509_v48 = vadd.f32 %v1508_v20, %v1419_v12  ;;  %v1244_v51 = vpop.f32.mrf.mxu0  ;;  %v918_v21 = vsub.f32 1.0, %v854_v2  ;;  %v920_v31 = vsub.f32 1.0, %v856_v44  ;;  %v690_v52 = vmax.f32 %v658_v22, 0.0 }
  0xcf   : > { %v919_v26 = vsub.f32 1.0, %v855_v53  ;;  %v921_v47 = vsub.f32 1.0, %v857_v32  ;;  %v349_v45 = vmin.f32 %v317_v39, 255.0  ;;  %v3118_v34 = vmin.f32 %v318_v50, 255.0 }
  0xd0   : > { %v3113_v63 = vpack.c.bf16 %v1509_v48, %v1507_v54  ;;  %v982_v23 = vmax.f32 %v918_v21, 0.0  ;;  %v984_v42 = vmax.f32 %v920_v31, 0.0  ;;  %v659_v54 = vadd.f32 %v2774_v35, %v626_v58 }
  0xd1   : > { %v1333_v36 = vpop.f32.mrf.mxu1  ;;  %v983_v12 = vmax.f32 %v919_v26, 0.0  ;;  %v534_v20 = vsub.f32 1.0, %v470_v15  ;;  %v985_v49 = vmax.f32 %v921_v47, 0.0  ;;  %v722_v4 = vmin.f32 %v690_v52, 255.0 }
  0xd2   : > { %v1334_v19 = vadd.f32 %v1333_v36, %v1244_v51  ;;  %v1638_v60 = vpack.c.bf16 %v984_v42, %v982_v23  ;;  %v691_v27 = vmax.f32 %v659_v54, 0.0  ;;  %v596_v38 = vmax.f32 %v532_v25, 0.0 }
  0xd3   : > { %v535_v14 = vsub.f32 1.0, %v471_v9  ;;  %v597_v17 = vmax.f32 %v533_v41, 0.0  ;;  %v1639_v39 = vpack.c.bf16 %v985_v49, %v983_v12  ;;  %v408_v15 = vsub.f32 %v349_v45, %v2672_v29 }
  0xd4   : > { %1283 = vmatmul.bf16.gmra.mxu0 %v1024_v43  ;;  %1372 = vmatmul.bf16.gmra.mxu1 %v1025_v46  ;;  %v1422_v40 = vpop.f32.mrf.mxu2  ;;  %v723_v51 = vmin.f32 %v691_v27, 255.0  ;;  %v410_v24 = vsub.f32 %v3118_v34, %v2672_v29  ;;  %v598_v36 = vmax.f32 %v534_v20, 0.0  ;;  %v409_v41 = vsub.f32 %v349_v45, %v2675_v30 }
  0xd5   : > { %1461 = vmatmul.bf16.gmra.mxu2 %v1024_v43  ;;  %1550 = vmatmul.bf16.gmra.mxu3 %v1025_v46  ;;  %v758_v43 = vsub.f32 %v722_v4, %v2672_v29  ;;  %v759_v46 = vsub.f32 %v722_v4, %v2675_v30  ;;  %v599_v53 = vmax.f32 %v535_v14, 0.0  ;;  %v3495_v26 = vcvt.s32.f32 %v2947_v59 }
  0xd6   : > { %v1246_v48 = vpop.f32.mrf.mxu0  ;;  %1833 = vmatpush.bf16.xpose.msrb.mxu2 %v1638_v60  ;;  %v760_v58 = vsub.f32 %v723_v51, %v2672_v29  ;;  %v761_v50 = vsub.f32 %v723_v51, %v2675_v30  ;;  %1922 = vmatpush.bf16.xpose.msrb.mxu3 %v1639_v39  ;;  %v472_v60 = vand.u32 2147483647, %v408_v15  ;;  %v474_v12 = vand.u32 2147483647, %v410_v24 }
  0xd7   : > { %v1511_v7 = vpop.f32.mrf.mxu3  ;;  %v822_v21 = vand.u32 2147483647, %v758_v43  ;;  %v823_v31 = vand.u32 2147483647, %v759_v46  ;;  %v254_v54 = vmul.f32 %v2615_v55, %v3495_v26  ;;  %v1026_v27 = vpack.c.bf16 %v598_v36, %v596_v38 }
  0xd8   : > { %v1512_v2 = vadd.f32 %v1511_v7, %v1422_v40  ;;  %v824_v22 = vand.u32 2147483647, %v760_v58  ;;  %v825_v25 = vand.u32 2147483647, %v761_v50  ;;  %v3496_v4 = vcvt.s32.f32 %v2952_v13 }
  0xd9   : > { %v1335_v44 = vpop.f32.mrf.mxu1  ;;  %v886_v23 = vsub.f32 1.0, %v822_v21  ;;  %v887_v42 = vsub.f32 1.0, %v823_v31  ;;  %v411_v59 = vsub.f32 %v3118_v34, %v2675_v30  ;;  %v473_v43 = vand.u32 2147483647, %v409_v41 }
  0xda   : > { %v1336_v9 = vadd.f32 %v1335_v44, %v1246_v48  ;;  %v888_v52 = vsub.f32 1.0, %v824_v22  ;;  %v889_v40 = vsub.f32 1.0, %v825_v25  ;;  %v255_v45 = vmul.f32 %v2615_v55, %v3496_v4 }
  0xdb   : > { %v950_v20 = vmax.f32 %v886_v23, 0.0  ;;  %v951_v49 = vmax.f32 %v887_v42, 0.0  ;;  %v1027_v48 = vpack.c.bf16 %v599_v53, %v597_v17  ;;  %v287_v46 = vadd.f32 %v2650_v18, %v254_v54 }
  0xdc   : > { %v3128_v32 = vpack.c.bf16 %v1336_v9, %v1334_v19  ;;  %v1424_v47 = vpop.f32.mrf.mxu2  ;;  %v952_v14 = vmax.f32 %v888_v52, 0.0  ;;  %v953_v51 = vmax.f32 %v889_v40, 0.0  ;;  %v288_v38 = vadd.f32 %v2650_v18, %v255_v45 }
  0xdd   : > { %v536_v13 = vsub.f32 1.0, %v472_v60  ;;  %v538_v15 = vsub.f32 1.0, %v474_v12  ;;  %v319_v17 = vmax.f32 %v287_v46, 0.0  ;;  %v475_v21 = vand.u32 2147483647, %v411_v59 }
  0xde   : > { %v1249_v7 = vpop.f32.mrf.mxu0  ;;  %v1622_v58 = vpack.c.bf16 %v952_v14, %v950_v20  ;;  %v1623_v50 = vpack.c.bf16 %v953_v51, %v951_v49  ;;  %v320_v36 = vmax.f32 %v288_v38, 0.0  ;;  %v3497_v34 = vcvt.s32.f32 %v2887_v57 }
  0xdf   : > { %v1513_v19 = vpop.f32.mrf.mxu3  ;;  %v351_v53 = vmin.f32 %v319_v17, 255.0  ;;  %v3499_v23 = vcvt.s32.f32 %v3017_v62  ;;  %v3500_v26 = vcvt.s32.f32 %v2892_v33  ;;  %v600_v54 = vmax.f32 %v536_v13, 0.0 }
  0xe0   : > { %v1514_v39 = vadd.f32 %v1513_v19, %v1424_v47  ;;  %1655 = vmatpush.bf16.xpose.msrb.mxu0 %v1622_v58  ;;  %1744 = vmatpush.bf16.xpose.msrb.mxu1 %v1623_v50  ;;  %v256_v31 = vmul.f32 %v2615_v55, %v3497_v34  ;;  %v352_v22 = vmin.f32 %v320_v36, 255.0  ;;  %v602_v47 = vmax.f32 %v538_v15, 0.0 }
  0xe1   : > { %v1338_v44 = vpop.f32.mrf.mxu1  ;;  %v640_v42 = vmul.f32 %v2734_v61, %v3499_v23  ;;  %v257_v57 = vmul.f32 %v2615_v55, %v3500_v26  ;;  %v537_v52 = vsub.f32 1.0, %v473_v43  ;;  %v412_v40 = vsub.f32 %v351_v53, %v2672_v29 }
  0xe2   : > { %v3140_v24 = vpack.c.bf16 %v1514_v39, %v1512_v2  ;;  %v1339_v9 = vadd.f32 %v1338_v44, %v1249_v7  ;;  %v3498_v2 = vcvt.s32.f32 %v3007_v56  ;;  %v289_v62 = vadd.f32 %v2650_v18, %v256_v31 }
  0xe3   : > { %v673_v20 = vadd.f32 %v2774_v35, %v640_v42  ;;  %v414_v4 = vsub.f32 %v352_v22, %v2672_v29  ;;  %v413_v33 = vsub.f32 %v351_v53, %v2675_v30  ;;  %v415_v45 = vsub.f32 %v352_v22, %v2675_v30 }
  0xe4   : > { %1288 = vmatmul.bf16.gmra.mxu0 %v1026_v27  ;;  %1377 = vmatmul.bf16.gmra.mxu1 %v1027_v48  ;;  %v1427_v25 = vpop.f32.mrf.mxu2  ;;  %v639_v41 = vmul.f32 %v2734_v61, %v3498_v2  ;;  %v290_v14 = vadd.f32 %v2650_v18, %v257_v57  ;;  %v1028_v59 = vpack.c.bf16 %v602_v47, %v600_v54  ;;  %v601_v39 = vmax.f32 %v537_v52, 0.0 }
  0xe5   : > { %1466 = vmatmul.bf16.gmra.mxu2 %v1026_v27  ;;  %1555 = vmatmul.bf16.gmra.mxu3 %v1027_v48  ;;  %v539_v27 = vsub.f32 1.0, %v475_v21  ;;  %v705_v48 = vmax.f32 %v673_v20, 0.0  ;;  %v476_v43 = vand.u32 2147483647, %v412_v40  ;;  %v321_v58 = vmax.f32 %v289_v62, 0.0 }
  0xe6   : > { %v1251_v12 = vpop.f32.mrf.mxu0  ;;  %v672_v56 = vadd.f32 %v2774_v35, %v639_v41  ;;  %v3164_v13 = vand.u32 2147483647, %v414_v4  ;;  %v3166_v15 = vand.u32 2147483647, %v413_v33  ;;  %v3168_v17 = vand.u32 2147483647, %v415_v45 }
  0xe7   : > { %v1516_v60 = vpop.f32.mrf.mxu3  ;;  %v603_v46 = vmax.f32 %v539_v27, 0.0  ;;  %v737_v44 = vmin.f32 %v705_v48, 255.0  ;;  %v322_v53 = vmax.f32 %v290_v14, 0.0  ;;  %v540_v22 = vsub.f32 1.0, %v476_v43 }
  0xe8   : > { %v1517_v49 = vadd.f32 %v1516_v60, %v1427_v25  ;;  %v704_v7 = vmax.f32 %v672_v56, 0.0  ;;  %v3502_v41 = vcvt.s32.f32 %v2576_v6  ;;  %v353_v4 = vmin.f32 %v321_v58, 255.0 }
  0xe9   : > { %v1340_v19 = vpop.f32.mrf.mxu1  ;;  %v788_v34 = vsub.f32 %v737_v44, %v2672_v29  ;;  %v789_v25 = vsub.f32 %v737_v44, %v2675_v30  ;;  %v1029_v26 = vpack.c.bf16 %v603_v46, %v601_v39  ;;  %v354_v46 = vmin.f32 %v322_v53, 255.0 }
  0xea   : > { %v1341_v51 = vadd.f32 %v1340_v19, %v1251_v12  ;;  %v736_v38 = vmin.f32 %v704_v7, 255.0  ;;  %v624_v23 = vmul.f32 %v2734_v61, %v3502_v41  ;;  %v541_v44 = vsub.f32 1.0, %v3166_v15 }
  0xeb   : > { %v852_v54 = vand.u32 2147483647, %v788_v34  ;;  %v853_v40 = vand.u32 2147483647, %v789_v25  ;;  %v604_v25 = vmax.f32 %v540_v22, 0.0  ;;  %v416_v53 = vsub.f32 %v353_v4, %v2672_v29 }
  0xec   : > { %v3162_v50 = vpack.c.bf16 %v1341_v51, %v1339_v9  ;;  %v1429_v36 = vpop.f32.mrf.mxu2  ;;  %v786_v21 = vsub.f32 %v736_v38, %v2672_v29  ;;  %v787_v31 = vsub.f32 %v736_v38, %v2675_v30  ;;  %v3501_v9 = vcvt.s32.f32 %v2573_v5 }
  0xed   : > { %v657_v12 = vadd.f32 %v2774_v35, %v624_v23  ;;  %v916_v20 = vsub.f32 1.0, %v852_v54  ;;  %v917_v45 = vsub.f32 1.0, %v853_v40  ;;  %v542_v38 = vsub.f32 1.0, %v3164_v13 }
  0xee   : > { %v623_v2 = vmul.f32 %v2734_v61, %v3501_v9  ;;  %v850_v57 = vand.u32 2147483647, %v786_v21  ;;  %v851_v47 = vand.u32 2147483647, %v787_v31  ;;  %v417_v23 = vsub.f32 %v353_v4, %v2675_v30 }
  0xef   : > { %v1518_v42 = vpop.f32.mrf.mxu3  ;;  %v980_v48 = vmax.f32 %v916_v20, 0.0  ;;  %v689_v51 = vmax.f32 %v657_v12, 0.0  ;;  %v981_v39 = vmax.f32 %v917_v45, 0.0  ;;  %v3503_v12 = vcvt.s32.f32 %v2800_v16 }
  0xf0   : > { %v1519_v52 = vadd.f32 %v1518_v42, %v1429_v36  ;;  %v656_v60 = vadd.f32 %v2774_v35, %v623_v2  ;;  %v914_v5 = vsub.f32 1.0, %v850_v57  ;;  %v915_v62 = vsub.f32 1.0, %v851_v47 }
  0xf1   : > { %v1254_v27 = vpop.f32.mrf.mxu0  ;;  %v1343_v56 = vpop.f32.mrf.mxu1  ;;  %v721_v58 = vmin.f32 %v689_v51, 255.0  ;;  %v543_v36 = vsub.f32 1.0, %v3168_v17  ;;  %v418_v17 = vsub.f32 %v354_v46, %v2672_v29  ;;  %v419_v47 = vsub.f32 %v354_v46, %v2675_v30 }
  0xf2   : > { %v3182_v6 = vpack.c.bf16 %v1519_v52, %v1517_v49  ;;  %v1344_v33 = vadd.f32 %v1343_v56, %v1254_v27  ;;  %v688_v19 = vmax.f32 %v656_v60, 0.0  ;;  %v978_v7 = vmax.f32 %v914_v5, 0.0 }
  0xf3   : > { %v979_v14 = vmax.f32 %v915_v62, 0.0  ;;  %v756_v9 = vsub.f32 %v721_v58, %v2672_v29  ;;  %v258_v27 = vmul.f32 %v2615_v55, %v3503_v12  ;;  %v606_v56 = vmax.f32 %v542_v38, 0.0 }
  0xf4   : > { %1293 = vmatmul.bf16.gmra.mxu0 %v1028_v59  ;;  %1382 = vmatmul.bf16.gmra.mxu1 %v1029_v26  ;;  %v720_v43 = vmin.f32 %v688_v19, 255.0  ;;  %v1636_v49 = vpack.c.bf16 %v980_v48, %v978_v7  ;;  %v605_v5 = vmax.f32 %v541_v44, 0.0  ;;  %v607_v4 = vmax.f32 %v543_v36, 0.0 }
  0xf5   : > { %1471 = vmatmul.bf16.gmra.mxu2 %v1028_v59  ;;  %1560 = vmatmul.bf16.gmra.mxu3 %v1029_v26  ;;  %v1637_v21 = vpack.c.bf16 %v981_v39, %v979_v14  ;;  %v757_v59 = vsub.f32 %v721_v58, %v2675_v30  ;;  %v820_v22 = vand.u32 2147483647, %v756_v9  ;;  %v480_v51 = vand.u32 2147483647, %v416_v53 }
  0xf6   : > { %v754_v34 = vsub.f32 %v720_v43, %v2672_v29  ;;  %v755_v31 = vsub.f32 %v720_v43, %v2675_v30  ;;  %1834 = vmatpush.bf16.xpose.msrb.mxu2 %v1636_v49  ;;  %v482_v39 = vand.u32 2147483647, %v418_v17  ;;  %v481_v43 = vand.u32 2147483647, %v417_v23 }
  0xf7   : > { %1923 = vmatpush.bf16.xpose.msrb.mxu3 %v1637_v21  ;;  %v821_v54 = vand.u32 2147483647, %v757_v59  ;;  %v884_v20 = vsub.f32 1.0, %v820_v22  ;;  %v483_v46 = vand.u32 2147483647, %v419_v47  ;;  %v3504_v49 = vcvt.s32.f32 %v2807_v28 }
  0xf8   : > { %v1432_v13 = vpop.f32.mrf.mxu2  ;;  %v1521_v2 = vpop.f32.mrf.mxu3  ;;  %v818_v15 = vand.u32 2147483647, %v754_v34  ;;  %v819_v41 = vand.u32 2147483647, %v755_v31  ;;  %v291_v38 = vadd.f32 %v2650_v18, %v258_v27  ;;  %v1030_v34 = vpack.c.bf16 %v606_v56, %v604_v25 }
  0xf9   : > { %v1522_v42 = vadd.f32 %v1521_v2, %v1432_v13  ;;  %v1256_v26 = vpop.f32.mrf.mxu0  ;;  %v1345_v57 = vpop.f32.mrf.mxu1  ;;  %v885_v62 = vsub.f32 1.0, %v821_v54  ;;  %v948_v48 = vmax.f32 %v884_v20, 0.0  ;;  %v259_v16 = vmul.f32 %v2615_v55, %v3504_v49 }
  0xfa   : > { %v1346_v52 = vadd.f32 %v1345_v57, %v1256_v26  ;;  %v882_v40 = vsub.f32 1.0, %v818_v15  ;;  %v883_v60 = vsub.f32 1.0, %v819_v41  ;;  %v1031_v36 = vpack.c.bf16 %v607_v4, %v605_v5 }
  0xfb   : > { %v949_v14 = vmax.f32 %v885_v62, 0.0  ;;  %v292_v31 = vadd.f32 %v2650_v18, %v259_v16  ;;  %v323_v9 = vmax.f32 %v291_v38, 0.0  ;;  %v544_v2 = vsub.f32 1.0, %v480_v51 }
  0xfc   : > { %v3198_v45 = vpack.c.bf16 %v1346_v52, %v1344_v33  ;;  %v946_v19 = vmax.f32 %v882_v40, 0.0  ;;  %v947_v7 = vmax.f32 %v883_v60, 0.0  ;;  %v546_v28 = vsub.f32 1.0, %v482_v39 }
  0xfd   : > { %v545_v41 = vsub.f32 1.0, %v481_v43  ;;  %v547_v17 = vsub.f32 1.0, %v483_v46  ;;  %v324_v23 = vmax.f32 %v292_v31, 0.0  ;;  %v355_v25 = vmin.f32 %v323_v9, 255.0 }
  0xfe   : > { %v1620_v44 = vpack.c.bf16 %v948_v48, %v946_v19  ;;  %v1621_v58 = vpack.c.bf16 %v949_v14, %v947_v7  ;;  %v608_v57 = vmax.f32 %v544_v2, 0.0  ;;  %v610_v22 = vmax.f32 %v546_v28, 0.0 }
  0xff   : > { %v3505_v54 = vcvt.s32.f32 %v2986_v11  ;;  %v3506_v52 = vcvt.s32.f32 %v2999_v0  ;;  %v609_v60 = vmax.f32 %v545_v41, 0.0  ;;  %v611_v12 = vmax.f32 %v547_v17, 0.0 }
 0x100   : > { %v1434_v21 = vpop.f32.mrf.mxu2  ;;  %v1523_v33 = vpop.f32.mrf.mxu3  ;;  %1656 = vmatpush.bf16.xpose.msrb.mxu0 %v1620_v44  ;;  %1745 = vmatpush.bf16.xpose.msrb.mxu1 %v1621_v58  ;;  %v356_v27 = vmin.f32 %v324_v23, 255.0  ;;  %v3507_v5 = vcvt.s32.f32 %v2740_v8  ;;  %v420_v11 = vsub.f32 %v355_v25, %v2672_v29  ;;  %v1032_v48 = vpack.c.bf16 %v610_v22, %v608_v57 }
 0x101   : > { %v1524_v59 = vadd.f32 %v1523_v33, %v1434_v21  ;;  %v1259_v53 = vpop.f32.mrf.mxu0  ;;  %v1348_v13 = vpop.f32.mrf.mxu1  ;;  %v637_v47 = vmul.f32 %v2734_v61, %v3505_v54  ;;  %v638_v40 = vmul.f32 %v2734_v61, %v3506_v52  ;;  %v1033_v43 = vpack.c.bf16 %v611_v12, %v609_v60 }
 0x102   : > { %v1349_v15 = vadd.f32 %v1348_v13, %v1259_v53  ;;  %v260_v20 = vmul.f32 %v2615_v55, %v3507_v5  ;;  %v422_v46 = vsub.f32 %v356_v27, %v2672_v29  ;;  %v421_v49 = vsub.f32 %v355_v25, %v2675_v30 }
 0x103   : > { %v3205_v26 = vpack.c.bf16 %v1524_v59, %v1522_v42  ;;  %v670_v42 = vadd.f32 %v2774_v35, %v637_v47  ;;  %v671_v56 = vadd.f32 %v2774_v35, %v638_v40  ;;  %v3508_v38 = vcvt.s32.f32 %v2744_v10 }
 0x104   : > { %1298 = vmatmul.bf16.gmra.mxu0 %v1030_v34  ;;  %1387 = vmatmul.bf16.gmra.mxu1 %v1031_v36  ;;  %v3225_v58 = vadd.f32 %v2650_v18, %v260_v20  ;;  %v3229_v33 = vand.u32 2147483647, %v420_v11  ;;  %v3239_v53 = vand.u32 2147483647, %v422_v46  ;;  %v485_v13 = vand.u32 2147483647, %v421_v49 }
 0x105   : > { %1476 = vmatmul.bf16.gmra.mxu2 %v1030_v34  ;;  %1565 = vmatmul.bf16.gmra.mxu3 %v1031_v36  ;;  %v702_v14 = vmax.f32 %v670_v42, 0.0  ;;  %v703_v51 = vmax.f32 %v671_v56, 0.0  ;;  %v261_v44 = vmul.f32 %v2615_v55, %v3508_v38  ;;  %v423_v34 = vsub.f32 %v356_v27, %v2675_v30 }
 0x106   : > { %v3509_v36 = vcvt.s32.f32 %v2551_v1  ;;  %v3510_v2 = vcvt.s32.f32 %v2566_v3  ;;  %v550_v38 = vsub.f32 1.0, %v3239_v53 }
 0x107   : > { %v734_v16 = vmin.f32 %v702_v14, 255.0  ;;  %v735_v8 = vmin.f32 %v703_v51, 255.0  ;;  %v3246_v23 = vadd.f32 %v2650_v18, %v261_v44  ;;  %v487_v22 = vand.u32 2147483647, %v423_v34 }
 0x108   : > { %v1437_v62 = vpop.f32.mrf.mxu2  ;;  %v1526_v4 = vpop.f32.mrf.mxu3  ;;  %v621_v31 = vmul.f32 %v2734_v61, %v3509_v36  ;;  %v622_v28 = vmul.f32 %v2734_v61, %v3510_v2  ;;  %v548_v51 = vsub.f32 1.0, %v3229_v33  ;;  %v325_v36 = vmax.f32 %v3225_v58, 0.0 }
 0x109   : > { %v1527_v19 = vadd.f32 %v1526_v4, %v1437_v62  ;;  %v1261_v7 = vpop.f32.mrf.mxu0  ;;  %v1350_v0 = vpop.f32.mrf.mxu1  ;;  %v782_v9 = vsub.f32 %v734_v16, %v2672_v29  ;;  %v784_v59 = vsub.f32 %v735_v8, %v2672_v29  ;;  %v783_v10 = vsub.f32 %v734_v16, %v2675_v30 }
 0x10a   : > { %v1351_v39 = vadd.f32 %v1350_v0, %v1261_v7  ;;  %v785_v55 = vsub.f32 %v735_v8, %v2675_v30  ;;  %v655_v47 = vadd.f32 %v2774_v35, %v622_v28  ;;  %v551_v44 = vsub.f32 1.0, %v487_v22 }
 0x10b   : > { %v846_v1 = vand.u32 2147483647, %v782_v9  ;;  %v848_v41 = vand.u32 2147483647, %v784_v59  ;;  %v847_v17 = vand.u32 2147483647, %v783_v10 }
 0x10c   : > { %v3227_v21 = vpack.c.bf16 %v1351_v39, %v1349_v15  ;;  %v654_v15 = vadd.f32 %v2774_v35, %v621_v31  ;;  %v849_v54 = vand.u32 2147483647, %v785_v55  ;;  %v687_v5 = vmax.f32 %v655_v47, 0.0 }
 0x10d   : > { %v910_v12 = vsub.f32 1.0, %v846_v1  ;;  %v912_v61 = vsub.f32 1.0, %v848_v41  ;;  %v911_v27 = vsub.f32 1.0, %v847_v17  ;;  %v549_v39 = vsub.f32 1.0, %v485_v13 }
 0x10e   : > { %v686_v52 = vmax.f32 %v654_v15, 0.0  ;;  %v913_v56 = vsub.f32 1.0, %v849_v54  ;;  %v719_v35 = vmin.f32 %v687_v5, 255.0  ;;  %v326_v59 = vmax.f32 %v3246_v23, 0.0 }
 0x10f   : > { %v974_v18 = vmax.f32 %v910_v12, 0.0  ;;  %v976_v4 = vmax.f32 %v912_v61, 0.0  ;;  %v975_v11 = vmax.f32 %v911_v27, 0.0  ;;  %v612_v2 = vmax.f32 %v548_v51, 0.0 }
 0x110   : > { %v1439_v25 = vpop.f32.mrf.mxu2  ;;  %v1528_v57 = vpop.f32.mrf.mxu3  ;;  %v718_v20 = vmin.f32 %v686_v52, 255.0  ;;  %v977_v7 = vmax.f32 %v913_v56, 0.0  ;;  %v753_v8 = vsub.f32 %v719_v35, %v2675_v30  ;;  %v613_v28 = vmax.f32 %v549_v39, 0.0 }
 0x111   : > { %v1529_v40 = vadd.f32 %v1528_v57, %v1439_v25  ;;  %v1264_v60 = vpop.f32.mrf.mxu0  ;;  %v1353_v3 = vpop.f32.mrf.mxu1  ;;  %v1634_v46 = vpack.c.bf16 %v976_v4, %v974_v18  ;;  %v614_v25 = vmax.f32 %v550_v38, 0.0  ;;  %v615_v58 = vmax.f32 %v551_v44, 0.0 }
 0x112   : > { %v1354_v42 = vadd.f32 %v1353_v3, %v1264_v60  ;;  %v750_v0 = vsub.f32 %v718_v20, %v2672_v29  ;;  %v751_v14 = vsub.f32 %v718_v20, %v2675_v30  ;;  %v1635_v49 = vpack.c.bf16 %v977_v7, %v975_v11 }
 0x113   : > { %v3249_v62 = vpack.c.bf16 %v1529_v40, %v1527_v19  ;;  %v752_v19 = vsub.f32 %v719_v35, %v2672_v29  ;;  %1835 = vmatpush.bf16.xpose.msrb.mxu2 %v1634_v46  ;;  %v817_v9 = vand.u32 2147483647, %v753_v8  ;;  %v357_v22 = vmin.f32 %v325_v36, 255.0 }
 0x114   : > { %1303 = vmatmul.bf16.gmra.mxu0 %v1032_v48  ;;  %1392 = vmatmul.bf16.gmra.mxu1 %v1033_v43  ;;  %v814_v16 = vand.u32 2147483647, %v750_v0  ;;  %v815_v34 = vand.u32 2147483647, %v751_v14  ;;  %v358_v40 = vmin.f32 %v326_v59, 255.0  ;;  %v1034_v3 = vpack.c.bf16 %v614_v25, %v612_v2 }
 0x115   : > { %1481 = vmatmul.bf16.gmra.mxu2 %v1032_v48  ;;  %1570 = vmatmul.bf16.gmra.mxu3 %v1033_v43  ;;  %v816_v43 = vand.u32 2147483647, %v752_v19  ;;  %v881_v17 = vsub.f32 1.0, %v817_v9  ;;  %v1035_v12 = vpack.c.bf16 %v615_v58, %v613_v28  ;;  %v424_v61 = vsub.f32 %v357_v22, %v2672_v29 }
 0x116   : > { %1924 = vmatpush.bf16.xpose.msrb.mxu3 %v1635_v49  ;;  %v878_v33 = vsub.f32 1.0, %v814_v16  ;;  %v879_v15 = vsub.f32 1.0, %v815_v34  ;;  %v426_v5 = vsub.f32 %v358_v40, %v2672_v29  ;;  %v425_v20 = vsub.f32 %v357_v22, %v2675_v30 }
 0x117   : > { %v880_v1 = vsub.f32 1.0, %v816_v43  ;;  %v945_v52 = vmax.f32 %v881_v17, 0.0  ;;  %v488_v0 = vand.u32 2147483647, %v424_v61 }
 0x118   : > { %v1442_v31 = vpop.f32.mrf.mxu2  ;;  %v1531_v48 = vpop.f32.mrf.mxu3  ;;  %v942_v41 = vmax.f32 %v878_v33, 0.0  ;;  %v943_v57 = vmax.f32 %v879_v15, 0.0  ;;  %v490_v14 = vand.u32 2147483647, %v426_v5  ;;  %v489_v51 = vand.u32 2147483647, %v425_v20 }
 0x119   : > { %v1532_v10 = vadd.f32 %v1531_v48, %v1442_v31  ;;  %v1266_v55 = vpop.f32.mrf.mxu0  ;;  %v1355_v13 = vpop.f32.mrf.mxu1  ;;  %v944_v47 = vmax.f32 %v880_v1, 0.0  ;;  %v552_v46 = vsub.f32 1.0, %v488_v0 }
 0x11a   : > { %v1356_v53 = vadd.f32 %v1355_v13, %v1266_v55  ;;  %v1619_v60 = vpack.c.bf16 %v945_v52, %v943_v57  ;;  %v554_v19 = vsub.f32 1.0, %v490_v14  ;;  %v553_v16 = vsub.f32 1.0, %v489_v51 }
 0x11b   : > { %v1618_v23 = vpack.c.bf16 %v944_v47, %v942_v41  ;;  %v616_v36 = vmax.f32 %v552_v46, 0.0 }
 0x11c   : > { %v3259_v54 = vpack.c.bf16 %v1356_v53, %v1354_v42  ;;  %1746 = vmatpush.bf16.xpose.msrb.mxu1 %v1619_v60  ;;  %v427_v42 = vsub.f32 %v358_v40, %v2675_v30  ;;  %v618_v48 = vmax.f32 %v554_v19, 0.0  ;;  %v617_v43 = vmax.f32 %v553_v16, 0.0 }
 0x11d   : > { %1657 = vmatpush.bf16.xpose.msrb.mxu0 %v1618_v23 }
 0x11e   : > { %v491_v39 = vand.u32 2147483647, %v427_v42 }
 0x120   : > { %v1444_v27 = vpop.f32.mrf.mxu2  ;;  %v1533_v56 = vpop.f32.mrf.mxu3  ;;  %v555_v30 = vsub.f32 1.0, %v491_v39 }
 0x121   : > { %v1534_v18 = vadd.f32 %v1533_v56, %v1444_v27  ;;  %v1269_v4 = vpop.f32.mrf.mxu0  ;;  %v1358_v11 = vpop.f32.mrf.mxu1 }
 0x122   : > { %v1359_v7 = vadd.f32 %v1358_v11, %v1269_v4  ;;  %v619_v33 = vmax.f32 %v555_v30, 0.0 }
 0x123   : > { %v3265_v35 = vpack.c.bf16 %v1534_v18, %v1532_v10  ;;  %v1036_v10 = vpack.c.bf16 %v618_v48, %v616_v36 }
 0x124   : > { %1308 = vmatmul.bf16.gmra.mxu0 %v1034_v3  ;;  %1397 = vmatmul.bf16.gmra.mxu1 %v1035_v12  ;;  %v1037_v55 = vpack.c.bf16 %v619_v33, %v617_v43 }
 0x125   : > { %1486 = vmatmul.bf16.gmra.mxu2 %v1034_v3  ;;  %1575 = vmatmul.bf16.gmra.mxu3 %v1035_v12 }
 0x128   : > { %v1447_v29 = vpop.f32.mrf.mxu2  ;;  %v1536_v49 = vpop.f32.mrf.mxu3 }
 0x129   : > { %v1537_v8 = vadd.f32 %v1536_v49, %v1447_v29  ;;  %v1271_v38 = vpop.f32.mrf.mxu0  ;;  %v1360_v44 = vpop.f32.mrf.mxu1 }
 0x12a   : > { %v1361_v34 = vadd.f32 %v1360_v44, %v1271_v38 }
 0x12c   : > { %v3267_v31 = vpack.c.bf16 %v1361_v34, %v1359_v7 }
 0x130   : > { %v1449_v9 = vpop.f32.mrf.mxu2  ;;  %v1538_v59 = vpop.f32.mrf.mxu3 }
 0x131   : > { %v1539_v13 = vadd.f32 %v1538_v59, %v1449_v9  ;;  %v1274_v2 = vpop.f32.mrf.mxu0  ;;  %v1363_v28 = vpop.f32.mrf.mxu1 }
 0x132   : > { %v1364_v15 = vadd.f32 %v1363_v28, %v1274_v2 }
 0x133   : > { %v3269_v53 = vpack.c.bf16 %v1539_v13, %v1537_v8 }
 0x134   : > { %1313 = vmatmul.bf16.gmra.mxu0 %v1036_v10  ;;  %1402 = vmatmul.bf16.gmra.mxu1 %v1037_v55 }
 0x135   : > { %1491 = vmatmul.bf16.gmra.mxu2 %v1036_v10  ;;  %1580 = vmatmul.bf16.gmra.mxu3 %v1037_v55 }
 0x138   : > { %v1452_v1 = vpop.f32.mrf.mxu2  ;;  %v1541_v41 = vpop.f32.mrf.mxu3 }
 0x139   : > { %v1542_v17 = vadd.f32 %v1541_v41, %v1452_v1  ;;  %v1276_v25 = vpop.f32.mrf.mxu0  ;;  %v1365_v58 = vpop.f32.mrf.mxu1 }
 0x13a   : > { %v1366_v57 = vadd.f32 %v1365_v58, %v1276_v25 }
 0x13c   : > { %v3271_v22 = vpack.c.bf16 %v1366_v57, %v1364_v15 }
 0x140   : > { %v1454_v47 = vpop.f32.mrf.mxu2  ;;  %v1543_v52 = vpop.f32.mrf.mxu3 }
 0x141   : > { %v1544_v40 = vadd.f32 %v1543_v52, %v1454_v47  ;;  %v1279_v23 = vpop.f32.mrf.mxu0  ;;  %v1368_v60 = vpop.f32.mrf.mxu1 }
 0x142   : > { %v1369_v3 = vadd.f32 %v1368_v60, %v1279_v23 }
 0x143   : > { %v3273_v12 = vpack.c.bf16 %v1544_v40, %v1542_v17 }
 0x144   : > { %1658 = vmatmul.bf16.vlgmr.msrb.gmra.mxu0 %v3097_v37  ;;  %1747 = vmatmul.bf16.vlgmr.msrb.gmra.mxu1 %v3113_v63 }
 0x145   : > { %1836 = vmatmul.bf16.vlgmr.msrb.gmra.mxu2 %v3097_v37  ;;  %1925 = vmatmul.bf16.vlgmr.msrb.gmra.mxu3 %v3113_v63 }
 0x148   : > { %v1457_v61 = vpop.f32.mrf.mxu2  ;;  %v1546_v27 = vpop.f32.mrf.mxu3 }
 0x149   : > { %v1547_v56 = vadd.f32 %v1546_v27, %v1457_v61  ;;  %v1281_v5 = vpop.f32.mrf.mxu0  ;;  %v1370_v20 = vpop.f32.mrf.mxu1 }
 0x14a   : > { %v1371_v42 = vadd.f32 %v1370_v20, %v1281_v5 }
 0x14c   : > { %v3279_v18 = vpack.c.bf16 %v1371_v42, %v1369_v3 }
 0x150   : > { %v1459_v4 = vpop.f32.mrf.mxu2  ;;  %v1548_v11 = vpop.f32.mrf.mxu3 }
 0x151   : > { %v1549_v7 = vadd.f32 %v1548_v11, %v1459_v4  ;;  %v1284_v0 = vpop.f32.mrf.mxu0  ;;  %v1373_v14 = vpop.f32.mrf.mxu1 }
 0x152   : > { %v1374_v51 = vadd.f32 %v1373_v14, %v1284_v0 }
 0x153   : > { %v3281_v39 = vpack.c.bf16 %v1549_v7, %v1547_v56 }
 0x154   : > { %1663 = vmatmul.bf16.gmra.mxu0 %v3128_v32  ;;  %1752 = vmatmul.bf16.gmra.mxu1 %v3140_v24 }
 0x155   : > { %1841 = vmatmul.bf16.gmra.mxu2 %v3128_v32  ;;  %1930 = vmatmul.bf16.gmra.mxu3 %v3140_v24 }
 0x158   : > { %v1462_v37 = vpop.f32.mrf.mxu2  ;;  %v1551_v63 = vpop.f32.mrf.mxu3 }
 0x159   : > { %v1552_v46 = vadd.f32 %v1551_v63, %v1462_v37  ;;  %v1286_v29 = vpop.f32.mrf.mxu0  ;;  %v1375_v49 = vpop.f32.mrf.mxu1 }
 0x15a   : > { %v1376_v19 = vadd.f32 %v1375_v49, %v1286_v29 }
 0x15c   : > { %v3287_v16 = vpack.c.bf16 %v1376_v19, %v1374_v51 }
 0x160   : > { %v1464_v30 = vpop.f32.mrf.mxu2  ;;  %v1553_v8 = vpop.f32.mrf.mxu3 }
 0x161   : > { %v1554_v38 = vadd.f32 %v1553_v8, %v1464_v30  ;;  %v1289_v44 = vpop.f32.mrf.mxu0  ;;  %v1378_v34 = vpop.f32.mrf.mxu1 }
 0x162   : > { %v1379_v36 = vadd.f32 %v1378_v34, %v1289_v44 }
 0x163   : > { %v3289_v48 = vpack.c.bf16 %v1554_v38, %v1552_v46 }
 0x164   : > { %1668 = vmatmul.bf16.gmra.mxu0 %v3162_v50  ;;  %1757 = vmatmul.bf16.gmra.mxu1 %v3182_v6 }
 0x165   : > { %1846 = vmatmul.bf16.gmra.mxu2 %v3162_v50  ;;  %1935 = vmatmul.bf16.gmra.mxu3 %v3182_v6 }
 0x168   : > { %v1467_v32 = vpop.f32.mrf.mxu2  ;;  %v1556_v24 = vpop.f32.mrf.mxu3 }
 0x169   : > { %v1557_v43 = vadd.f32 %v1556_v24, %v1467_v32  ;;  %v1291_v33 = vpop.f32.mrf.mxu0  ;;  %v1380_v9 = vpop.f32.mrf.mxu1 }
 0x16a   : > { %v1381_v59 = vadd.f32 %v1380_v9, %v1291_v33 }
 0x16c   : > { %v3295_v10 = vpack.c.bf16 %v1381_v59, %v1379_v36 }
 0x170   : > { %v1469_v55 = vpop.f32.mrf.mxu2  ;;  %v1558_v13 = vpop.f32.mrf.mxu3 }
 0x171   : > { %v1559_v2 = vadd.f32 %v1558_v13, %v1469_v55  ;;  %v1294_v28 = vpop.f32.mrf.mxu0  ;;  %v1383_v15 = vpop.f32.mrf.mxu1 }
 0x172   : > { %v1384_v1 = vadd.f32 %v1383_v15, %v1294_v28 }
 0x173   : > { %v3297_v41 = vpack.c.bf16 %v1559_v2, %v1557_v43 }
 0x174   : > { %1673 = vmatmul.bf16.gmra.mxu0 %v3198_v45  ;;  %1762 = vmatmul.bf16.gmra.mxu1 %v3205_v26 }
 0x175   : > { %1851 = vmatmul.bf16.gmra.mxu2 %v3198_v45  ;;  %1940 = vmatmul.bf16.gmra.mxu3 %v3205_v26 }
 0x178   : > { %v1472_v50 = vpop.f32.mrf.mxu2  ;;  %v1561_v6 = vpop.f32.mrf.mxu3 }
 0x179   : > { %v1562_v17 = vadd.f32 %v1561_v6, %v1472_v50  ;;  %v1296_v25 = vpop.f32.mrf.mxu0  ;;  %v1385_v58 = vpop.f32.mrf.mxu1 }
 0x17a   : > { %v1386_v57 = vadd.f32 %v1385_v58, %v1296_v25 }
 0x17c   : > { %v3303_v47 = vpack.c.bf16 %v1386_v57, %v1384_v1 }
 0x180   : > { %v1474_v52 = vpop.f32.mrf.mxu2  ;;  %v1563_v40 = vpop.f32.mrf.mxu3 }
 0x181   : > { %v1564_v23 = vadd.f32 %v1563_v40, %v1474_v52  ;;  %v1299_v60 = vpop.f32.mrf.mxu0  ;;  %v1388_v3 = vpop.f32.mrf.mxu1 }
 0x182   : > { %v1389_v61 = vadd.f32 %v1388_v3, %v1299_v60 }
 0x183   : > { %v3305_v27 = vpack.c.bf16 %v1564_v23, %v1562_v17 }
 0x184   : > { %1678 = vmatmul.bf16.gmra.mxu0 %v3227_v21  ;;  %1767 = vmatmul.bf16.gmra.mxu1 %v3249_v62 }
 0x185   : > { %1856 = vmatmul.bf16.gmra.mxu2 %v3227_v21  ;;  %1945 = vmatmul.bf16.gmra.mxu3 %v3249_v62 }
 0x188   : > { %v1477_v45 = vpop.f32.mrf.mxu2  ;;  %v1566_v26 = vpop.f32.mrf.mxu3 }
 0x189   : > { %v1567_v56 = vadd.f32 %v1566_v26, %v1477_v45  ;;  %v1301_v5 = vpop.f32.mrf.mxu0  ;;  %v1390_v20 = vpop.f32.mrf.mxu1 }
 0x18a   : > { %v1391_v42 = vadd.f32 %v1390_v20, %v1301_v5 }
 0x18c   : > { %v3311_v4 = vpack.c.bf16 %v1391_v42, %v1389_v61 }
 0x190   : > { %v1479_v11 = vpop.f32.mrf.mxu2  ;;  %v1568_v7 = vpop.f32.mrf.mxu3 }
 0x191   : > { %v1569_v0 = vadd.f32 %v1568_v7, %v1479_v11  ;;  %v1304_v14 = vpop.f32.mrf.mxu0  ;;  %v1393_v51 = vpop.f32.mrf.mxu1 }
 0x192   : > { %v1394_v37 = vadd.f32 %v1393_v51, %v1304_v14 }
 0x193   : > { %v3313_v63 = vpack.c.bf16 %v1569_v0, %v1567_v56 }
 0x194   : > { %1683 = vmatmul.bf16.gmra.mxu0 %v3259_v54  ;;  %1772 = vmatmul.bf16.gmra.mxu1 %v3265_v35 }
 0x195   : > { %1861 = vmatmul.bf16.gmra.mxu2 %v3259_v54  ;;  %1950 = vmatmul.bf16.gmra.mxu3 %v3265_v35 }
 0x198   : > { %v1482_v21 = vpop.f32.mrf.mxu2  ;;  %v1571_v62 = vpop.f32.mrf.mxu3 }
 0x199   : > { %v1572_v46 = vadd.f32 %v1571_v62, %v1482_v21  ;;  %v1306_v29 = vpop.f32.mrf.mxu0  ;;  %v1395_v49 = vpop.f32.mrf.mxu1 }
 0x19a   : > { %v1396_v19 = vadd.f32 %v1395_v49, %v1306_v29 }
 0x19c   : > { %v3319_v30 = vpack.c.bf16 %v1396_v19, %v1394_v37 }
 0x1a0   : > { %v1484_v8 = vpop.f32.mrf.mxu2  ;;  %v1573_v38 = vpop.f32.mrf.mxu3 }
 0x1a1   : > { %v1574_v44 = vadd.f32 %v1573_v38, %v1484_v8  ;;  %v1309_v34 = vpop.f32.mrf.mxu0  ;;  %v1398_v36 = vpop.f32.mrf.mxu1 }
 0x1a2   : > { %v1399_v32 = vadd.f32 %v1398_v36, %v1309_v34 }
 0x1a3   : > { %v3321_v24 = vpack.c.bf16 %v1574_v44, %v1572_v46 }
 0x1a4   : > { %1688 = vmatmul.bf16.gmra.mxu0 %v3267_v31  ;;  %1777 = vmatmul.bf16.gmra.mxu1 %v3269_v53 }
 0x1a5   : > { %1866 = vmatmul.bf16.gmra.mxu2 %v3267_v31  ;;  %1955 = vmatmul.bf16.gmra.mxu3 %v3269_v53 }
 0x1a8   : > { %v1487_v54 = vpop.f32.mrf.mxu2  ;;  %v1576_v35 = vpop.f32.mrf.mxu3 }
 0x1a9   : > { %v1577_v43 = vadd.f32 %v1576_v35, %v1487_v54  ;;  %v1311_v33 = vpop.f32.mrf.mxu0  ;;  %v1400_v9 = vpop.f32.mrf.mxu1 }
 0x1aa   : > { %v1401_v59 = vadd.f32 %v1400_v9, %v1311_v33 }
 0x1ac   : > { %v3327_v55 = vpack.c.bf16 %v1401_v59, %v1399_v32 }
 0x1b0   : > { %v1489_v13 = vpop.f32.mrf.mxu2  ;;  %v1578_v2 = vpop.f32.mrf.mxu3 }
 0x1b1   : > { %v1579_v28 = vadd.f32 %v1578_v2, %v1489_v13  ;;  %v1314_v15 = vpop.f32.mrf.mxu0  ;;  %v1403_v1 = vpop.f32.mrf.mxu1 }
 0x1b2   : > { %v1404_v50 = vadd.f32 %v1403_v1, %v1314_v15 }
 0x1b3   : > { %v3329_v6 = vpack.c.bf16 %v1579_v28, %v1577_v43 }
 0x1b4   : > { %1693 = vmatmul.bf16.gmra.mxu0 %v3271_v22  ;;  %1782 = vmatmul.bf16.gmra.mxu1 %v3273_v12 }
 0x1b5   : > { %1871 = vmatmul.bf16.gmra.mxu2 %v3271_v22  ;;  %1960 = vmatmul.bf16.gmra.mxu3 %v3273_v12 }
 0x1b8   : > { %v1492_v31 = vpop.f32.mrf.mxu2  ;;  %v1581_v53 = vpop.f32.mrf.mxu3 }
 0x1b9   : > { %v1582_v17 = vadd.f32 %v1581_v53, %v1492_v31  ;;  %v1316_v25 = vpop.f32.mrf.mxu0  ;;  %v1405_v58 = vpop.f32.mrf.mxu1 }
 0x1ba   : > { %v1406_v57 = vadd.f32 %v1405_v58, %v1316_v25 }
 0x1bc   : > { %v3336_v52 = vpack.c.bf16 %v1406_v57, %v1404_v50 }
 0x1c0   : > { %v1494_v40 = vpop.f32.mrf.mxu2  ;;  %v1583_v23 = vpop.f32.mrf.mxu3 }
 0x1c1   : > { %v1584_v60 = vadd.f32 %v1583_v23, %v1494_v40  ;;  %v1659_v3 = vpop.f32.mrf.mxu0  ;;  %v1748_v61 = vpop.f32.mrf.mxu1 }
 0x1c2   : > { %v1749_v45 = vadd.f32 %v1748_v61, %v1659_v3 }
 0x1c3   : > { %v3340_v22 = vpack.c.bf16 %v1584_v60, %v1582_v17 }
 0x1c4   : > { %2006 = vst [vmem:[%s3342_s21] sm:$0xff] %v1749_v45  ;;  %1698 = vmatmul.bf16.gmra.mxu0 %v3279_v18  ;;  %1787 = vmatmul.bf16.gmra.mxu1 %v3281_v39 }
 0x1c5   : > { %1876 = vmatmul.bf16.gmra.mxu2 %v3279_v18  ;;  %1965 = vmatmul.bf16.gmra.mxu3 %v3281_v39 }
 0x1c8   : > { %v1837_v12 = vpop.f32.mrf.mxu2  ;;  %v1926_v26 = vpop.f32.mrf.mxu3 }
 0x1c9   : > { %v1927_v56 = vadd.f32 %v1926_v26, %v1837_v12  ;;  %v1661_v5 = vpop.f32.mrf.mxu0  ;;  %v1750_v20 = vpop.f32.mrf.mxu1 }
 0x1ca   : > { %v1751_v42 = vadd.f32 %v1750_v20, %v1661_v5 }
 0x1cb   : > { %2007 = vst [vmem:[%s3342_s21 + $0x8] sm:$0xff] %v1927_v56 }
 0x1cc   : > { %2008 = vst [vmem:[%s3342_s21 + $0x10] sm:$0xff] %v1751_v42 }
 0x1d0   : > { %v1839_v11 = vpop.f32.mrf.mxu2  ;;  %v1928_v7 = vpop.f32.mrf.mxu3 }
 0x1d1   : > { %v1929_v0 = vadd.f32 %v1928_v7, %v1839_v11  ;;  %v1664_v14 = vpop.f32.mrf.mxu0  ;;  %v1753_v51 = vpop.f32.mrf.mxu1 }
 0x1d2   : > { %v1754_v18 = vadd.f32 %v1753_v51, %v1664_v14 }
 0x1d3   : > { %2009 = vst [vmem:[%s3342_s21 + $0x18] sm:$0xff] %v1929_v0 }
 0x1d4   : > { %2010 = vst [vmem:[%s3342_s21 + $0x20] sm:$0xff] %v1754_v18  ;;  %1703 = vmatmul.bf16.gmra.mxu0 %v3287_v16  ;;  %1792 = vmatmul.bf16.gmra.mxu1 %v3289_v48 }
 0x1d5   : > { %1881 = vmatmul.bf16.gmra.mxu2 %v3287_v16  ;;  %1970 = vmatmul.bf16.gmra.mxu3 %v3289_v48 }
 0x1d8   : > { %v1842_v39 = vpop.f32.mrf.mxu2  ;;  %v1931_v37 = vpop.f32.mrf.mxu3 }
 0x1d9   : > { %v1932_v21 = vadd.f32 %v1931_v37, %v1842_v39  ;;  %v1666_v62 = vpop.f32.mrf.mxu0  ;;  %v1755_v46 = vpop.f32.mrf.mxu1 }
 0x1da   : > { %v1756_v29 = vadd.f32 %v1755_v46, %v1666_v62 }
 0x1db   : > { %2011 = vst [vmem:[%s3342_s21 + $0x28] sm:$0xff] %v1932_v21 }
 0x1dc   : > { %2012 = vst [vmem:[%s3342_s21 + $0x30] sm:$0xff] %v1756_v29 }
 0x1e0   : > { %v1844_v49 = vpop.f32.mrf.mxu2  ;;  %v1933_v19 = vpop.f32.mrf.mxu3 }
 0x1e1   : > { %v1934_v8 = vadd.f32 %v1933_v19, %v1844_v49  ;;  %v1669_v38 = vpop.f32.mrf.mxu0  ;;  %v1758_v44 = vpop.f32.mrf.mxu1 }
 0x1e2   : > { %v1759_v16 = vadd.f32 %v1758_v44, %v1669_v38 }
 0x1e3   : > { %2013 = vst [vmem:[%s3342_s21 + $0x38] sm:$0xff] %v1934_v8 }
 0x1e4   : > { %2014 = vst [vmem:[%s3342_s21 + $0x40] sm:$0xff] %v1759_v16  ;;  %1708 = vmatmul.bf16.gmra.mxu0 %v3295_v10  ;;  %1797 = vmatmul.bf16.gmra.mxu1 %v3297_v41 }
 0x1e5   : > { %1886 = vmatmul.bf16.gmra.mxu2 %v3295_v10  ;;  %1975 = vmatmul.bf16.gmra.mxu3 %v3297_v41 }
 0x1e8   : > { %v1847_v48 = vpop.f32.mrf.mxu2  ;;  %v1936_v34 = vpop.f32.mrf.mxu3 }
 0x1e9   : > { %v1937_v36 = vadd.f32 %v1936_v34, %v1847_v48  ;;  %v1671_v32 = vpop.f32.mrf.mxu0  ;;  %v1760_v54 = vpop.f32.mrf.mxu1 }
 0x1ea   : > { %v1761_v35 = vadd.f32 %v1760_v54, %v1671_v32 }
 0x1eb   : > { %2015 = vst [vmem:[%s3342_s21 + $0x48] sm:$0xff] %v1937_v36 }
 0x1ec   : > { %2016 = vst [vmem:[%s3342_s21 + $0x50] sm:$0xff] %v1761_v35 }
 0x1f0   : > { %v1849_v43 = vpop.f32.mrf.mxu2  ;;  %v1938_v33 = vpop.f32.mrf.mxu3 }
 0x1f1   : > { %v1939_v9 = vadd.f32 %v1938_v33, %v1849_v43  ;;  %v1674_v59 = vpop.f32.mrf.mxu0  ;;  %v1763_v13 = vpop.f32.mrf.mxu1 }
 0x1f2   : > { %v1764_v10 = vadd.f32 %v1763_v13, %v1674_v59 }
 0x1f3   : > { %2017 = vst [vmem:[%s3342_s21 + $0x58] sm:$0xff] %v1939_v9 }
 0x1f4   : > { %2018 = vst [vmem:[%s3342_s21 + $0x60] sm:$0xff] %v1764_v10  ;;  %1713 = vmatmul.bf16.gmra.mxu0 %v3303_v47  ;;  %1802 = vmatmul.bf16.gmra.mxu1 %v3305_v27 }
 0x1f5   : > { %1891 = vmatmul.bf16.gmra.mxu2 %v3303_v47  ;;  %1980 = vmatmul.bf16.gmra.mxu3 %v3305_v27 }
 0x1f8   : > { %v1852_v41 = vpop.f32.mrf.mxu2  ;;  %v1941_v2 = vpop.f32.mrf.mxu3 }
 0x1f9   : > { %v1942_v28 = vadd.f32 %v1941_v2, %v1852_v41  ;;  %v1676_v15 = vpop.f32.mrf.mxu0  ;;  %v1765_v1 = vpop.f32.mrf.mxu1 }
 0x1fa   : > { %v1766_v50 = vadd.f32 %v1765_v1, %v1676_v15 }
 0x1fb   : > { %2019 = vst [vmem:[%s3342_s21 + $0x68] sm:$0xff] %v1942_v28 }
 0x1fc   : > { %2020 = vst [vmem:[%s3342_s21 + $0x70] sm:$0xff] %v1766_v50 }
 0x200   : > { %v1854_v31 = vpop.f32.mrf.mxu2  ;;  %v1943_v53 = vpop.f32.mrf.mxu3 }
 0x201   : > { %v1944_v17 = vadd.f32 %v1943_v53, %v1854_v31  ;;  %v1679_v25 = vpop.f32.mrf.mxu0  ;;  %v1768_v58 = vpop.f32.mrf.mxu1 }
 0x202   : > { %v1769_v47 = vadd.f32 %v1768_v58, %v1679_v25 }
 0x203   : > { %2021 = vst [vmem:[%s3342_s21 + $0x78] sm:$0xff] %v1944_v17 }
 0x204   : > { %2022 = vst [vmem:[%s3342_s21 + $0x80] sm:$0xff] %v1769_v47  ;;  %1718 = vmatmul.bf16.gmra.mxu0 %v3311_v4  ;;  %1807 = vmatmul.bf16.gmra.mxu1 %v3313_v63 }
 0x205   : > { %1896 = vmatmul.bf16.gmra.mxu2 %v3311_v4  ;;  %1985 = vmatmul.bf16.gmra.mxu3 %v3313_v63 }
 0x208   : > { %v1857_v27 = vpop.f32.mrf.mxu2  ;;  %v1946_v57 = vpop.f32.mrf.mxu3 }
 0x209   : > { %v1947_v40 = vadd.f32 %v1946_v57, %v1857_v27  ;;  %v1681_v23 = vpop.f32.mrf.mxu0  ;;  %v1770_v60 = vpop.f32.mrf.mxu1 }
 0x20a   : > { %v1771_v3 = vadd.f32 %v1770_v60, %v1681_v23 }
 0x20b   : > { %2023 = vst [vmem:[%s3342_s21 + $0x88] sm:$0xff] %v1947_v40 }
 0x20c   : > { %2024 = vst [vmem:[%s3342_s21 + $0x90] sm:$0xff] %v1771_v3 }
 0x210   : > { %v1859_v61 = vpop.f32.mrf.mxu2  ;;  %v1948_v45 = vpop.f32.mrf.mxu3 }
 0x211   : > { %v1949_v12 = vadd.f32 %v1948_v45, %v1859_v61  ;;  %v1684_v26 = vpop.f32.mrf.mxu0  ;;  %v1773_v56 = vpop.f32.mrf.mxu1 }
 0x212   : > { %v1774_v4 = vadd.f32 %v1773_v56, %v1684_v26 }
 0x213   : > { %2025 = vst [vmem:[%s3342_s21 + $0x98] sm:$0xff] %v1949_v12 }
 0x214   : > { %2026 = vst [vmem:[%s3342_s21 + $0xa0] sm:$0xff] %v1774_v4  ;;  %1723 = vmatmul.bf16.gmra.mxu0 %v3319_v30  ;;  %1812 = vmatmul.bf16.gmra.mxu1 %v3321_v24 }
 0x215   : > { %1901 = vmatmul.bf16.gmra.mxu2 %v3319_v30  ;;  %1990 = vmatmul.bf16.gmra.mxu3 %v3321_v24 }
 0x218   : > { %v1862_v63 = vpop.f32.mrf.mxu2  ;;  %v1951_v5 = vpop.f32.mrf.mxu3 }
 0x219   : > { %v1952_v20 = vadd.f32 %v1951_v5, %v1862_v63  ;;  %v1686_v42 = vpop.f32.mrf.mxu0  ;;  %v1775_v11 = vpop.f32.mrf.mxu1 }
 0x21a   : > { %v1776_v7 = vadd.f32 %v1775_v11, %v1686_v42 }
 0x21b   : > { %2027 = vst [vmem:[%s3342_s21 + $0xa8] sm:$0xff] %v1952_v20 }
 0x21c   : > { %2028 = vst [vmem:[%s3342_s21 + $0xb0] sm:$0xff] %v1776_v7 }
 0x220   : > { %v1864_v0 = vpop.f32.mrf.mxu2  ;;  %v1953_v14 = vpop.f32.mrf.mxu3 }
 0x221   : > { %v1954_v51 = vadd.f32 %v1953_v14, %v1864_v0  ;;  %v1689_v18 = vpop.f32.mrf.mxu0  ;;  %v1778_v39 = vpop.f32.mrf.mxu1 }
 0x222   : > { %v1779_v30 = vadd.f32 %v1778_v39, %v1689_v18 }
 0x223   : > { %2029 = vst [vmem:[%s3342_s21 + $0xb8] sm:$0xff] %v1954_v51 }
 0x224   : > { %2030 = vst [vmem:[%s3342_s21 + $0xc0] sm:$0xff] %v1779_v30  ;;  %1728 = vmatmul.bf16.gmra.mxu0 %v3327_v55  ;;  %1817 = vmatmul.bf16.gmra.mxu1 %v3329_v6 }
 0x225   : > { %1906 = vmatmul.bf16.gmra.mxu2 %v3327_v55  ;;  %1995 = vmatmul.bf16.gmra.mxu3 %v3329_v6 }
 0x228   : > { %v1867_v24 = vpop.f32.mrf.mxu2  ;;  %v1956_v37 = vpop.f32.mrf.mxu3 }
 0x229   : > { %v1957_v21 = vadd.f32 %v1956_v37, %v1867_v24  ;;  %v1691_v62 = vpop.f32.mrf.mxu0  ;;  %v1780_v46 = vpop.f32.mrf.mxu1 }
 0x22a   : > { %v1781_v29 = vadd.f32 %v1780_v46, %v1691_v62 }
 0x22b   : > { %2031 = vst [vmem:[%s3342_s21 + $0xc8] sm:$0xff] %v1957_v21 }
 0x22c   : > { %2032 = vst [vmem:[%s3342_s21 + $0xd0] sm:$0xff] %v1781_v29 }
 0x230   : > { %v1869_v49 = vpop.f32.mrf.mxu2  ;;  %v1958_v19 = vpop.f32.mrf.mxu3 }
 0x231   : > { %v1959_v8 = vadd.f32 %v1958_v19, %v1869_v49  ;;  %v1694_v38 = vpop.f32.mrf.mxu0  ;;  %v1783_v44 = vpop.f32.mrf.mxu1 }
 0x232   : > { %v1784_v55 = vadd.f32 %v1783_v44, %v1694_v38 }
 0x233   : > { %2033 = vst [vmem:[%s3342_s21 + $0xd8] sm:$0xff] %v1959_v8 }
 0x234   : > { %2034 = vst [vmem:[%s3342_s21 + $0xe0] sm:$0xff] %v1784_v55  ;;  %1733 = vmatmul.bf16.gmra.mxu0 %v3336_v52  ;;  %1822 = vmatmul.bf16.gmra.mxu1 %v3340_v22 }
 0x235   : > { %1911 = vmatmul.bf16.gmra.mxu2 %v3336_v52  ;;  %2000 = vmatmul.bf16.gmra.mxu3 %v3340_v22 }
 0x238   : > { %v1872_v6 = vpop.f32.mrf.mxu2  ;;  %v1961_v16 = vpop.f32.mrf.mxu3 }
 0x239   : > { %v1962_v48 = vadd.f32 %v1961_v16, %v1872_v6  ;;  %v1696_v34 = vpop.f32.mrf.mxu0  ;;  %v1785_v36 = vpop.f32.mrf.mxu1 }
 0x23a   : > { %v1786_v32 = vadd.f32 %v1785_v36, %v1696_v34 }
 0x23b   : > { %2035 = vst [vmem:[%s3342_s21 + $0xe8] sm:$0xff] %v1962_v48 }
 0x23c   : > { %2036 = vst [vmem:[%s3342_s21 + $0xf0] sm:$0xff] %v1786_v32 }
 0x240   : > { %v1874_v54 = vpop.f32.mrf.mxu2  ;;  %v1963_v35 = vpop.f32.mrf.mxu3 }
 0x241   : > { %v1964_v43 = vadd.f32 %v1963_v35, %v1874_v54  ;;  %v1699_v33 = vpop.f32.mrf.mxu0  ;;  %v1788_v9 = vpop.f32.mrf.mxu1 }
 0x242   : > { %v1789_v52 = vadd.f32 %v1788_v9, %v1699_v33 }
 0x243   : > { %2037 = vst [vmem:[%s3342_s21 + $0xf8] sm:$0xff] %v1964_v43 }
 0x244   : > { %2038 = vst [vmem:[%s3342_s21 + $0x100] sm:$0xff] %v1789_v52 }
 0x248   : > { %v1877_v22 = vpop.f32.mrf.mxu2  ;;  %v1966_v59 = vpop.f32.mrf.mxu3 }
 0x249   : > { %v1967_v13 = vadd.f32 %v1966_v59, %v1877_v22  ;;  %v1701_v10 = vpop.f32.mrf.mxu0  ;;  %v1790_v41 = vpop.f32.mrf.mxu1 }
 0x24a   : > { %v1791_v2 = vadd.f32 %v1790_v41, %v1701_v10 }
 0x24b   : > { %2039 = vst [vmem:[%s3342_s21 + $0x108] sm:$0xff] %v1967_v13 }
 0x24c   : > { %2040 = vst [vmem:[%s3342_s21 + $0x110] sm:$0xff] %v1791_v2 }
 0x250   : > { %v1879_v28 = vpop.f32.mrf.mxu2  ;;  %v1968_v15 = vpop.f32.mrf.mxu3 }
 0x251   : > { %v1969_v1 = vadd.f32 %v1968_v15, %v1879_v28  ;;  %v1704_v50 = vpop.f32.mrf.mxu0  ;;  %v1793_v31 = vpop.f32.mrf.mxu1 }
 0x252   : > { %v1794_v53 = vadd.f32 %v1793_v31, %v1704_v50 }
 0x253   : > { %2041 = vst [vmem:[%s3342_s21 + $0x118] sm:$0xff] %v1969_v1 }
 0x254   : > { %2042 = vst [vmem:[%s3342_s21 + $0x120] sm:$0xff] %v1794_v53 }
 0x258   : > { %v1882_v17 = vpop.f32.mrf.mxu2  ;;  %v1971_v25 = vpop.f32.mrf.mxu3 }
 0x259   : > { %v1972_v58 = vadd.f32 %v1971_v25, %v1882_v17  ;;  %v1706_v47 = vpop.f32.mrf.mxu0  ;;  %v1795_v27 = vpop.f32.mrf.mxu1 }
 0x25a   : > { %v1796_v57 = vadd.f32 %v1795_v27, %v1706_v47 }
 0x25b   : > { %2043 = vst [vmem:[%s3342_s21 + $0x128] sm:$0xff] %v1972_v58 }
 0x25c   : > { %2044 = vst [vmem:[%s3342_s21 + $0x130] sm:$0xff] %v1796_v57 }
 0x260   : > { %v1884_v40 = vpop.f32.mrf.mxu2  ;;  %v1973_v23 = vpop.f32.mrf.mxu3 }
 0x261   : > { %v1974_v60 = vadd.f32 %v1973_v23, %v1884_v40  ;;  %v1709_v3 = vpop.f32.mrf.mxu0  ;;  %v1798_v61 = vpop.f32.mrf.mxu1 }
 0x262   : > { %v1799_v45 = vadd.f32 %v1798_v61, %v1709_v3 }
 0x263   : > { %2045 = vst [vmem:[%s3342_s21 + $0x138] sm:$0xff] %v1974_v60 }
 0x264   : > { %2046 = vst [vmem:[%s3342_s21 + $0x140] sm:$0xff] %v1799_v45 }
 0x268   : > { %v1887_v12 = vpop.f32.mrf.mxu2  ;;  %v1976_v26 = vpop.f32.mrf.mxu3 }
 0x269   : > { %v1977_v56 = vadd.f32 %v1976_v26, %v1887_v12  ;;  %v1711_v4 = vpop.f32.mrf.mxu0  ;;  %v1800_v63 = vpop.f32.mrf.mxu1 }
 0x26a   : > { %v1801_v5 = vadd.f32 %v1800_v63, %v1711_v4 }
 0x26b   : > { %2047 = vst [vmem:[%s3342_s21 + $0x148] sm:$0xff] %v1977_v56 }
 0x26c   : > { %2048 = vst [vmem:[%s3342_s21 + $0x150] sm:$0xff] %v1801_v5 }
 0x270   : > { %v1889_v20 = vpop.f32.mrf.mxu2  ;;  %v1978_v42 = vpop.f32.mrf.mxu3 }
 0x271   : > { %v1979_v11 = vadd.f32 %v1978_v42, %v1889_v20  ;;  %v1714_v7 = vpop.f32.mrf.mxu0  ;;  %v1803_v0 = vpop.f32.mrf.mxu1 }
 0x272   : > { %v1804_v14 = vadd.f32 %v1803_v0, %v1714_v7 }
 0x273   : > { %2049 = vst [vmem:[%s3342_s21 + $0x158] sm:$0xff] %v1979_v11 }
 0x274   : > { %2050 = vst [vmem:[%s3342_s21 + $0x160] sm:$0xff] %v1804_v14 }
 0x278   : > { %v1892_v51 = vpop.f32.mrf.mxu2  ;;  %v1981_v18 = vpop.f32.mrf.mxu3 }
 0x279   : > { %v1982_v39 = vadd.f32 %v1981_v18, %v1892_v51  ;;  %v1716_v30 = vpop.f32.mrf.mxu0  ;;  %v1805_v24 = vpop.f32.mrf.mxu1 }
 0x27a   : > { %v1806_v37 = vadd.f32 %v1805_v24, %v1716_v30 }
 0x27b   : > { %2051 = vst [vmem:[%s3342_s21 + $0x168] sm:$0xff] %v1982_v39 }
 0x27c   : > { %2052 = vst [vmem:[%s3342_s21 + $0x170] sm:$0xff] %v1806_v37 }
 0x280   : > { %v1894_v21 = vpop.f32.mrf.mxu2  ;;  %v1983_v62 = vpop.f32.mrf.mxu3 }
 0x281   : > { %v1984_v46 = vadd.f32 %v1983_v62, %v1894_v21  ;;  %v1719_v29 = vpop.f32.mrf.mxu0  ;;  %v1808_v49 = vpop.f32.mrf.mxu1 }
 0x282   : > { %v1809_v19 = vadd.f32 %v1808_v49, %v1719_v29 }
 0x283   : > { %2053 = vst [vmem:[%s3342_s21 + $0x178] sm:$0xff] %v1984_v46 }
 0x284   : > { %2054 = vst [vmem:[%s3342_s21 + $0x180] sm:$0xff] %v1809_v19 }
 0x288   : > { %v1897_v8 = vpop.f32.mrf.mxu2  ;;  %v1986_v38 = vpop.f32.mrf.mxu3 }
 0x289   : > { %v1987_v44 = vadd.f32 %v1986_v38, %v1897_v8  ;;  %v1721_v55 = vpop.f32.mrf.mxu0  ;;  %v1810_v6 = vpop.f32.mrf.mxu1 }
 0x28a   : > { %v1811_v16 = vadd.f32 %v1810_v6, %v1721_v55 }
 0x28b   : > { %2055 = vst [vmem:[%s3342_s21 + $0x188] sm:$0xff] %v1987_v44 }
 0x28c   : > { %2056 = vst [vmem:[%s3342_s21 + $0x190] sm:$0xff] %v1811_v16 }
 0x290   : > { %v1899_v48 = vpop.f32.mrf.mxu2  ;;  %v1988_v34 = vpop.f32.mrf.mxu3 }
 0x291   : > { %v1989_v36 = vadd.f32 %v1988_v34, %v1899_v48  ;;  %v1724_v32 = vpop.f32.mrf.mxu0  ;;  %v1813_v54 = vpop.f32.mrf.mxu1 }
 0x292   : > { %v1814_v35 = vadd.f32 %v1813_v54, %v1724_v32 }
 0x293   : > { %2057 = vst [vmem:[%s3342_s21 + $0x198] sm:$0xff] %v1989_v36 }
 0x294   : > { %2058 = vst [vmem:[%s3342_s21 + $0x1a0] sm:$0xff] %v1814_v35 }
 0x298   : > { %v1902_v43 = vpop.f32.mrf.mxu2  ;;  %v1991_v33 = vpop.f32.mrf.mxu3 }
 0x299   : > { %v1992_v9 = vadd.f32 %v1991_v33, %v1902_v43  ;;  %v1726_v52 = vpop.f32.mrf.mxu0  ;;  %v1815_v22 = vpop.f32.mrf.mxu1 }
 0x29a   : > { %v1816_v59 = vadd.f32 %v1815_v22, %v1726_v52 }
 0x29b   : > { %2059 = vst [vmem:[%s3342_s21 + $0x1a8] sm:$0xff] %v1992_v9 }
 0x29c   : > { %2060 = vst [vmem:[%s3342_s21 + $0x1b0] sm:$0xff] %v1816_v59 }
 0x2a0   : > { %v1904_v13 = vpop.f32.mrf.mxu2  ;;  %v1993_v10 = vpop.f32.mrf.mxu3 }
 0x2a1   : > { %v1994_v41 = vadd.f32 %v1993_v10, %v1904_v13  ;;  %v1729_v2 = vpop.f32.mrf.mxu0  ;;  %v1818_v28 = vpop.f32.mrf.mxu1 }
 0x2a2   : > { %v1819_v15 = vadd.f32 %v1818_v28, %v1729_v2 }
 0x2a3   : > { %2061 = vst [vmem:[%s3342_s21 + $0x1b8] sm:$0xff] %v1994_v41 }
 0x2a4   : > { %2062 = vst [vmem:[%s3342_s21 + $0x1c0] sm:$0xff] %v1819_v15 }
 0x2a8   : > { %v1907_v1 = vpop.f32.mrf.mxu2  ;;  %v1996_v50 = vpop.f32.mrf.mxu3 }
 0x2a9   : > { %v1997_v31 = vadd.f32 %v1996_v50, %v1907_v1  ;;  %v1731_v53 = vpop.f32.mrf.mxu0  ;;  %v1820_v17 = vpop.f32.mrf.mxu1 }
 0x2aa   : > { %v1821_v25 = vadd.f32 %v1820_v17, %v1731_v53 }
 0x2ab   : > { %2063 = vst [vmem:[%s3342_s21 + $0x1c8] sm:$0xff] %v1997_v31 }
 0x2ac   : > { %2064 = vst [vmem:[%s3342_s21 + $0x1d0] sm:$0xff] %v1821_v25 }
 0x2b0   : > { %v1909_v58 = vpop.f32.mrf.mxu2  ;;  %v1998_v47 = vpop.f32.mrf.mxu3 }
 0x2b1   : > { %v1999_v27 = vadd.f32 %v1998_v47, %v1909_v58  ;;  %v1734_v57 = vpop.f32.mrf.mxu0  ;;  %v1823_v40 = vpop.f32.mrf.mxu1 }
 0x2b2   : > { %v1824_v23 = vadd.f32 %v1823_v40, %v1734_v57 }
 0x2b3   : > { %2065 = vst [vmem:[%s3342_s21 + $0x1d8] sm:$0xff] %v1999_v27 }
 0x2b4   : > { %2066 = vst [vmem:[%s3342_s21 + $0x1e0] sm:$0xff] %v1824_v23 }
 0x2b8   : > { %v1912_v60 = vpop.f32.mrf.mxu2  ;;  %v2001_v3 = vpop.f32.mrf.mxu3 }
 0x2b9   : > { %v2002_v61 = vadd.f32 %v2001_v3, %v1912_v60  ;;  %v1736_v45 = vpop.f32.mrf.mxu0  ;;  %v1825_v12 = vpop.f32.mrf.mxu1 }
 0x2ba   : > { %v1826_v26 = vadd.f32 %v1825_v12, %v1736_v45 }
 0x2bb   : > { %2067 = vst [vmem:[%s3342_s21 + $0x1e8] sm:$0xff] %v2002_v61 }
 0x2bc   : > { %2068 = vst [vmem:[%s3342_s21 + $0x1f0] sm:$0xff] %v1826_v26 }
 0x2c0   : > { %v1914_v56 = vpop.f32.mrf.mxu2  ;;  %v2003_v4 = vpop.f32.mrf.mxu3 }
 0x2c1   : > { %v2004_v63 = vadd.f32 %v2003_v4, %v1914_v56 }
 0x2c3   : > { %2069 = vst [vmem:[%s3342_s21 + $0x1f8] sm:$0xff] %v2004_v63 }
 0x2c4   : > { %2431 = shalt.err (!%p2428_p8)
}
 0x2c5   : > { %s2473_s7 = smov 256   ;;  %s2474_s8 = smov 16  }
 0x2c6   : > { %2341 = dma.vmem_to_hbm [thread:$0]  (%p2528_p5), %s2084_s26, 8192, %s2086_s27, %s2071_s13, %s2473_s7, %s2473_s7, %s2474_s8  }
 0x2c7 PF: > { %p2353_p9 = scmp.ge.s32.totalorder %s2470_s12, 2  ;;  %s2100_s14 = sand.u32 1, %s2458_s9  }
 0x2c8   : > { %s2101_s16 = scalar_lea.sflag [#allocation3], %s2100_s14 }
 0x2c9   : > { %p2348_p10 = pnand %p2353_p9, %p2532_p6 }
 0x2cb   : > { %p2349_p11 = pneg %p2348_p10 }
 0x2cd   : > { %2453 = dma.done.wait (%p2349_p11), %s2101_s16, 8192  }
 0x2ce   : > { %2455 = vsyncadd (%p2349_p11), %s2101_s16, 4294959104  ;;  %p13_p12 = scmp.ge.s32.totalorder %s2515_s15, 4   ;;  %s3511_s9 = smov %s2462_s10 }
 0x2cf   : > { %s3512_s10 = smov %s2466_s11  ;;  %s3513_s11 = smov %s2526_s18 }
 0x2d0   : > { %s3514_s12 = smov %s2515_s15  ;;  %15 = sbr.rel (!%p13_p12) target bundleno = 4 (0x4), region = 68 }
 0x2d5   :  { %2107 = vsyncpa [#allocation3], 1 }
 0x2d6   :  { %2109 = vsyncpa [#allocation3 + $0x1], 1 }
 0x2d7   :  { %2110 = vsyncpa [#allocation4], 1 }
 0x2d8   :  { %2112 = vsyncpa [#allocation4 + $0x1], 1 }

</bundles_post_ra>
